<compile_context>
chip_gen: v7x
topology: tpu7x:2x2x1
jax: 0.10.0
libtpu: 0.0.40
codegen_flags: <defaults>
</compile_context>

<pallas_src>
import numpy as np

import jax
import jax.numpy as jnp
from jax.experimental import pallas as pl
from jax.experimental.pallas import tpu as pltpu


# ----------------------------------------------------------------------------
# Fixed (synthetic) architecture constants
# ----------------------------------------------------------------------------
IMG_C, IMG_H, IMG_W = 3, 16, 16
CONV_OC, CONV_K, CONV_S, CONV_P = 8, 3, 2, 1
OUT_H = (IMG_H + 2 * CONV_P - CONV_K) // CONV_S + 1          # 8
OUT_W = (IMG_W + 2 * CONV_P - CONV_K) // CONV_S + 1          # 8
HW = OUT_H * OUT_W                                            # 64
N_IMG = IMG_C * IMG_H * IMG_W                                 # 768
N_CONV = CONV_OC * HW                                         # 512
N_FEAT = 32
EMB_DIM = 16
HALF = EMB_DIM // 2                                           # 8
T_HID = 32                                                    # time-MLP width
SEQ_T, ACT_A = 8, 4
N_ACT = SEQ_T * ACT_A                                         # 32
MLP_HID = 128
OUT_WIDTH = 128                                               # lane-dense fused output

_VMEM_SPEC = pl.BlockSpec(memory_space=pltpu.MemorySpace.VMEM)


# ----------------------------------------------------------------------------
# Packed noise-slab row layout (static python ints -> static ref slices)
# ----------------------------------------------------------------------------
def _build_noise_layout():
    blocks = [("freqs", 1), ("tw1_sin", HALF), ("tw1_cos", HALF), ("t_b1", 1),
              ("t_w2f", T_HID), ("b1f", 1), ("m_w1_s", N_ACT), ("m_w1_c", N_FEAT),
              ("m_w2", MLP_HID), ("m_b2", 1), ("m_w3", MLP_HID), ("m_b3", 1)]
    layout, r = {}, 0
    for name, n in blocks:
        layout[name] = (r, r + n)
        r += n
    return layout, r


_NL, _NL_ROWS = _build_noise_layout()                         # 373 rows x 128


# ----------------------------------------------------------------------------
# In-kernel helpers
# ----------------------------------------------------------------------------
def _mish(y):
    # numerically stable softplus: max(y,0) + log1p(exp(-|y|))
    sp = jnp.maximum(y, 0.0) + jnp.log1p(jnp.exp(-jnp.abs(y)))
    return y * jnp.tanh(sp)


def _dot(a, b):
    return jnp.dot(a, b, preferred_element_type=jnp.float32)


def _np_blk(np_ref, name, ncols=MLP_HID):
    r0, r1 = _NL[name]
    return np_ref[r0:r1, 0:ncols]


def _vision_compute(x_ref, vis_ref, vhead_ref):
    """x(B, C*H*W) -> feats(B, 32).  Conv lowered to one dense matmul (host-prefolded);
    avg-pool + fc folded into a single (N_CONV, N_FEAT) matrix."""
    conv = jnp.maximum(
        _dot(x_ref[...], vis_ref[0:N_IMG, :]) + vis_ref[N_IMG:N_IMG + 1, :], 0.0)
    feat = _dot(conv, vhead_ref[0:N_CONV, :]) + vhead_ref[N_CONV:N_CONV + 1, :]
    return feat                                               # (B, N_FEAT) f32


def _noise_compute(ts_ref, s_ref, cond, np_ref):
    """timestep(B,1), sample_flat(B,32), cond(B,32) -> noise(B,32)."""
    # sinusoidal time embedding; freqs precomputed on host and baked into the slab
    args = ts_ref[...] * _np_blk(np_ref, "freqs", HALF)       # (B, HALF)
    temb = _mish(_dot(jnp.sin(args), _np_blk(np_ref, "tw1_sin", T_HID))
                 + _dot(jnp.cos(args), _np_blk(np_ref, "tw1_cos", T_HID))
                 + _np_blk(np_ref, "t_b1", T_HID))            # (B, T_HID)
    # cond MLP; t_w2 / t_b2 are pre-folded into t_w2f / b1f (shorter serial MXU chain)
    h = _mish(_dot(s_ref[...], _np_blk(np_ref, "m_w1_s"))
              + _dot(temb, _np_blk(np_ref, "t_w2f"))
              + _dot(cond, _np_blk(np_ref, "m_w1_c"))
              + _np_blk(np_ref, "b1f"))                       # (B, 128)
    h = _mish(_dot(h, _np_blk(np_ref, "m_w2")) + _np_blk(np_ref, "m_b2"))
    noise = (_dot(h, _np_blk(np_ref, "m_w3", N_ACT))
             + _np_blk(np_ref, "m_b3", N_ACT))                # (B, N_ACT)
    return noise


# ----------------------------------------------------------------------------
# Kernels (gridless; full arrays resident in VMEM)
# ----------------------------------------------------------------------------
def _vision_kernel(x_ref, vis_ref, vhead_ref, o_ref):
    o_ref[...] = _vision_compute(x_ref, vis_ref, vhead_ref).astype(o_ref.dtype)


def _noise_kernel(ts_ref, s_ref, c_ref, np_ref, o_ref):
    o_ref[...] = _noise_compute(ts_ref, s_ref, c_ref[...], np_ref).astype(o_ref.dtype)


def _dnd_fused_kernel(x_ref, ts_ref, s_ref, vis_ref, vhead_ref, np_ref, o_ref):
    # feats stay in VMEM / vregs; single lane-dense (B, 128) output store
    feat = _vision_compute(x_ref, vis_ref, vhead_ref)
    noise = _noise_compute(ts_ref, s_ref, feat, np_ref)
    pad = jnp.zeros((noise.shape[0], OUT_WIDTH - N_ACT - N_FEAT), jnp.float32)
    o_ref[...] = jnp.concatenate([noise, feat, pad], axis=-1).astype(o_ref.dtype)


# ----------------------------------------------------------------------------
# Wrappers (one pallas_call each)
# ----------------------------------------------------------------------------
def vision_encoder(params, obs_img):
    """obs_img: (B, 3, H, W) NCHW float32 -> (B, 32) feature.  One pallas_call."""
    b = obs_img.shape[0]
    x_flat = obs_img.reshape(b, N_IMG)                        # contiguous reshape
    return pl.pallas_call(
        _vision_kernel,
        out_shape=jax.ShapeDtypeStruct((b, N_FEAT), jnp.float32),
        in_specs=[_VMEM_SPEC] * 3,
        out_specs=_VMEM_SPEC,
    )(x_flat, params["vis_slab"], params["vhead_slab"])


def noise_pred_net(params, sample, timestep, global_cond):
    """sample: (B,T,A); timestep: scalar or (B,); global_cond: (B,32) -> (B,T,A)."""
    b, t, a = sample.shape
    s_flat = sample.reshape(b, t * a)
    ts = jnp.broadcast_to(jnp.atleast_1d(timestep), (b,)).astype(jnp.float32)
    ts = ts.reshape(b, 1)
    out = pl.pallas_call(
        _noise_kernel,
        out_shape=jax.ShapeDtypeStruct((b, N_ACT), jnp.float32),
        in_specs=[_VMEM_SPEC] * 4,
        out_specs=_VMEM_SPEC,
    )(ts, s_flat, global_cond, params["noise_slab"])
    return out.reshape(b, t, a)


@jax.jit
def dnd_vision_then_noise(params, obs_img, sample, timestep):
    """Back-to-back path as ONE fused pallas_call; feats never touch HBM mid-way."""
    b = obs_img.shape[0]
    t, a = sample.shape[1], sample.shape[2]
    x_flat = obs_img.reshape(b, N_IMG)
    s_flat = sample.reshape(b, t * a)
    ts = jnp.broadcast_to(jnp.atleast_1d(timestep), (b,)).astype(jnp.float32)
    ts = ts.reshape(b, 1)
    slab = pl.pallas_call(
        _dnd_fused_kernel,
        out_shape=jax.ShapeDtypeStruct((b, OUT_WIDTH), jnp.float32),
        in_specs=[_VMEM_SPEC] * 6,
        out_specs=_VMEM_SPEC,
    )(x_flat, ts, s_flat, params["vis_slab"], params["vhead_slab"],
      params["noise_slab"])
    noise = slab[:, :N_ACT].reshape(b, t, a)
    feats = slab[:, N_ACT:N_ACT + N_FEAT]
    return noise, feats


# ----------------------------------------------------------------------------
# Parameter construction (deterministic, synthetic) + host-side packing
# ----------------------------------------------------------------------------
def make_raw_params(key):
    ks = jax.random.split(key, 16)

    def init(k, shape, scale=0.05):
        return scale * jax.random.normal(k, shape, dtype=jnp.float32)

    p = {}
    # vision encoder: conv 3->8 (k=3,s=2,p=1), fc 8->32
    p["conv_w"] = init(ks[0], (CONV_OC, IMG_C, CONV_K, CONV_K))   # OIHW
    p["conv_b"] = init(ks[1], (CONV_OC,))
    p["fc_w"] = init(ks[2], (CONV_OC, N_FEAT))
    p["fc_b"] = init(ks[3], (N_FEAT,))
    # noise_pred_net: time MLP 16->32->32; main MLP (32+32+32)->128->128->32
    p["t_w1"] = init(ks[4], (EMB_DIM, T_HID))
    p["t_b1"] = init(ks[5], (T_HID,))
    p["t_w2"] = init(ks[6], (T_HID, T_HID))
    p["t_b2"] = init(ks[7], (T_HID,))
    p["m_w1"] = init(ks[8], (N_ACT + T_HID + N_FEAT, MLP_HID))    # rows: [s | temb | cond]
    p["m_b1"] = init(ks[9], (MLP_HID,))
    p["m_w2"] = init(ks[10], (MLP_HID, MLP_HID))
    p["m_b2"] = init(ks[11], (MLP_HID,))
    p["m_w3"] = init(ks[12], (MLP_HID, N_ACT))
    p["m_b3"] = init(ks[13], (N_ACT,))
    return p


def prepare_params(raw):
    """One-time host-side packing into 3 contiguous f32 slabs."""
    conv_w = np.asarray(raw["conv_w"], np.float32)                # (OC, C, kh, kw)
    conv_b = np.asarray(raw["conv_b"], np.float32)
    fc_w = np.asarray(raw["fc_w"], np.float32)
    fc_b = np.asarray(raw["fc_b"], np.float32)

    # conv lowered to a dense (C*H*W, OC*HW) matrix (im2col folded into the weight)
    w_big = np.zeros((N_IMG, N_CONV), np.float32)
    for oc in range(CONV_OC):
        for c in range(IMG_C):
            for kh in range(CONV_K):
                for kw in range(CONV_K):
                    wv = conv_w[oc, c, kh, kw]
                    for oh in range(OUT_H):
                        ih = CONV_S * oh + kh - CONV_P
                        if ih < 0 or ih >= IMG_H:
                            continue
                        for ow in range(OUT_W):
                            iw = CONV_S * ow + kw - CONV_P
                            if iw < 0 or iw >= IMG_W:
                                continue
                            w_big[c * IMG_H * IMG_W + ih * IMG_W + iw,
                                  oc * HW + oh * OUT_W + ow] += wv
    bias_flat = np.repeat(conv_b, HW)[None, :]                    # (1, OC*HW), oc-major
    vis_slab = np.concatenate([w_big, bias_flat], axis=0)         # (769, 512)

    # global-avg-pool + fc folded into a single (OC*HW, N_FEAT) matrix
    w_pf = np.repeat(fc_w / float(HW), HW, axis=0)                # (512, 32)
    vhead_slab = np.concatenate([w_pf, fc_b[None, :]], axis=0)    # (513, 32)

    # noise MLP slab (width 128); t_w2 / t_b2 folded into the cond MLP
    t_w1 = np.asarray(raw["t_w1"], np.float32)
    t_b1 = np.asarray(raw["t_b1"], np.float32)
    t_w2 = np.asarray(raw["t_w2"], np.float32)
    t_b2 = np.asarray(raw["t_b2"], np.float32)
    m_w1 = np.asarray(raw["m_w1"], np.float32)
    m_b1 = np.asarray(raw["m_b1"], np.float32)
    m_w1_s = m_w1[0:N_ACT]
    m_w1_t = m_w1[N_ACT:N_ACT + T_HID]
    m_w1_c = m_w1[N_ACT + T_HID:N_ACT + T_HID + N_FEAT]
    t_w2f = t_w2 @ m_w1_t                                         # (32, 128)
    b1f = m_b1[None, :] + t_b2[None, :] @ m_w1_t                  # (1, 128)

    k = np.arange(HALF, dtype=np.float32)
    freqs = np.exp(-np.log(10000.0) * k / float(HALF - 1))        # (8,)

    noise_slab = np.zeros((_NL_ROWS, MLP_HID), np.float32)

    def put(name, arr):
        arr = np.asarray(arr, np.float32)
        if arr.ndim == 1:
            arr = arr[None, :]
        r0, r1 = _NL[name]
        assert arr.shape[0] == r1 - r0
        noise_slab[r0:r1, :arr.shape[1]] = arr

    # NOTE: assumes the time embedding concatenates [sin | cos] (diffusion-policy order)
    put("freqs", freqs)
    put("tw1_sin", t_w1[:HALF])
    put("tw1_cos", t_w1[HALF:])
    put("t_b1", t_b1)
    put("t_w2f", t_w2f)
    put("b1f", b1f)
    put("m_w1_s", m_w1_s)
    put("m_w1_c", m_w1_c)
    put("m_w2", np.asarray(raw["m_w2"], np.float32))
    put("m_b2", np.asarray(raw["m_b2"], np.float32))
    put("m_w3", np.asarray(raw["m_w3"], np.float32))
    put("m_b3", np.asarray(raw["m_b3"], np.float32))

    return {"vis_slab": jnp.asarray(vis_slab),
            "vhead_slab": jnp.asarray(vhead_slab),
            "noise_slab": jnp.asarray(noise_slab)}


# ----------------------------------------------------------------------------
# DnD forward dispatcher (mirrors the PyTorch module's forward)
# ----------------------------------------------------------------------------
_vision_jit = jax.jit(vision_encoder)
_noise_jit = jax.jit(noise_pred_net)


def dnd_forward(params, func_name, **kwargs):
    if func_name == "vision_encoder":
        return _vision_jit(params, kwargs["obs_img"])
    elif func_name == "noise_pred_net":
        return _noise_jit(params, kwargs["sample"], kwargs["timestep"],
                          kwargs["global_cond"])
    raise ValueError(f"unknown func_name {func_name}")


# ----------------------------------------------------------------------------
# Pure-JAX references (for correctness validation only)
# ----------------------------------------------------------------------------
def _vision_ref(raw, obs_img):
    conv = jax.lax.conv_general_dilated(
        obs_img, raw["conv_w"], window_strides=(CONV_S, CONV_S),
        padding=((CONV_P, CONV_P), (CONV_P, CONV_P)),
        dimension_numbers=("NCHW", "OIHW", "NCHW"))
    conv = jnp.maximum(conv + raw["conv_b"][None, :, None, None], 0.0)
    pooled = conv.mean(axis=(2, 3))
    return pooled @ raw["fc_w"] + raw["fc_b"][None, :]


def _noise_ref(raw, sample, timestep, global_cond):
    b, t, a = sample.shape
    s = sample.reshape(b, t * a)
    ts = jnp.broadcast_to(jnp.atleast_1d(timestep), (b,)).astype(jnp.float32)
    k = jnp.arange(HALF, dtype=jnp.float32)
    freqs = jnp.exp(-jnp.log(10000.0) * k / float(HALF - 1))
    args = ts[:, None] * freqs[None, :]
    emb = jnp.concatenate([jnp.sin(args), jnp.cos(args)], axis=-1)
    temb = _mish(emb @ raw["t_w1"] + raw["t_b1"][None, :])
    temb = temb @ raw["t_w2"] + raw["t_b2"][None, :]
    x = jnp.concatenate([s, temb, global_cond], axis=-1)
    h = _mish(x @ raw["m_w1"] + raw["m_b1"][None, :])
    h = _mish(h @ raw["m_w2"] + raw["m_b2"][None, :])
    out = h @ raw["m_w3"] + raw["m_b3"][None, :]
    return out.reshape(b, t, a)


if __name__ == "__main__":
    key = jax.random.PRNGKey(0)
    k_param, k_img, k_sample = jax.random.split(key, 3)

    raw = make_raw_params(k_param)
    params = prepare_params(raw)

    B = 2
    obs_img = jax.random.normal(k_img, (B, IMG_C, IMG_H, IMG_W), dtype=jnp.float32)
    sample = jax.random.normal(k_sample, (B, SEQ_T, ACT_A), dtype=jnp.float32)
    timestep = jnp.array([3, 7], dtype=jnp.int32)

    # branch 1: vision encoder (single fused pallas_call)
    feats = dnd_forward(params, "vision_encoder", obs_img=obs_img)
    feats = jax.block_until_ready(feats)
    assert feats.shape == (B, N_FEAT)
    feats_ref = _vision_ref(raw, obs_img)
    assert jnp.allclose(feats, feats_ref, atol=2e-4, rtol=2e-4)

    # branch 2: noise prediction conditioned on vision features (single pallas_call)
    noise = dnd_forward(params, "noise_pred_net",
                        sample=sample, timestep=timestep, global_cond=feats)
    noise = jax.block_until_ready(noise)
    assert noise.shape == (B, SEQ_T, ACT_A)
    noise_ref = _noise_ref(raw, sample, timestep, feats)
    assert jnp.allclose(noise, noise_ref, atol=2e-4, rtol=2e-4)

    # combined path: ONE fused pallas_call for vision -> noise
    noise2, feats2 = dnd_vision_then_noise(params, obs_img, sample, timestep)
    noise2 = jax.block_until_ready(noise2)
    assert jnp.allclose(feats2, feats, atol=1e-5)
    assert jnp.allclose(noise2, noise, atol=1e-5)

    print("KERNEL_OK")
</pallas_src>

<mosaic_0001>
module attributes {stable_mosaic.version = 11 : i64} {
  func.func @_vision_kernel(%arg0: memref<2x768xf32, #tpu.memory_space<vmem>>, %arg1: memref<769x512xf32, #tpu.memory_space<vmem>>, %arg2: memref<513x32xf32, #tpu.memory_space<vmem>>, %arg3: memref<2x32xf32, #tpu.memory_space<vmem>>) attributes {dimension_semantics = [], scalar_prefetch = 0 : i64, scratch_operands = 0 : i64, tpu.core_type = #tpu.core_type<tc>} {
    %c0 = arith.constant 0 : index
    %c0_0 = arith.constant 0 : index
    %0 = vector.load %arg0[%c0, %c0_0] : memref<2x768xf32, #tpu.memory_space<vmem>>, vector<2x768xf32>
    %c0_1 = arith.constant 0 : index
    %c0_2 = arith.constant 0 : index
    %1 = vector.load %arg1[%c0_1, %c0_2] : memref<769x512xf32, #tpu.memory_space<vmem>>, vector<768x512xf32>
    %cst = arith.constant dense<0.000000e+00> : vector<2x512xf32>
    %2 = tpu.matmul %0, %1, %cst {dimension_numbers = #tpu.dot_dimension_numbers<[1], [0], [0], [1], [0, 0, 1, 1], [], []>} : vector<2x768xf32>, vector<768x512xf32>, vector<2x512xf32> -> vector<2x512xf32>
    %c768 = arith.constant 768 : index
    %c0_3 = arith.constant 0 : index
    %3 = vector.load %arg1[%c768, %c0_3] : memref<769x512xf32, #tpu.memory_space<vmem>>, vector<1x512xf32>
    %4 = vector.broadcast %3 : vector<1x512xf32> to vector<2x512xf32>
    %5 = arith.addf %2, %4 : vector<2x512xf32>
    %cst_4 = arith.constant 0.000000e+00 : f32
    %6 = vector.broadcast %cst_4 : f32 to vector<2x512xf32>
    %7 = arith.maximumf %5, %6 : vector<2x512xf32>
    %c0_5 = arith.constant 0 : index
    %c0_6 = arith.constant 0 : index
    %8 = vector.load %arg2[%c0_5, %c0_6] : memref<513x32xf32, #tpu.memory_space<vmem>>, vector<512x32xf32>
    %cst_7 = arith.constant dense<0.000000e+00> : vector<2x32xf32>
    %9 = tpu.matmul %7, %8, %cst_7 {dimension_numbers = #tpu.dot_dimension_numbers<[1], [0], [0], [1], [0, 0, 1, 1], [], []>} : vector<2x512xf32>, vector<512x32xf32>, vector<2x32xf32> -> vector<2x32xf32>
    %c512 = arith.constant 512 : index
    %c0_8 = arith.constant 0 : index
    %10 = vector.load %arg2[%c512, %c0_8] : memref<513x32xf32, #tpu.memory_space<vmem>>, vector<1x32xf32>
    %11 = vector.broadcast %10 : vector<1x32xf32> to vector<2x32xf32>
    %12 = arith.addf %9, %11 : vector<2x32xf32>
    %c0_9 = arith.constant 0 : index
    %c0_10 = arith.constant 0 : index
    %13 = vector.load %arg3[%c0_9, %c0_10] : memref<2x32xf32, #tpu.memory_space<vmem>>, vector<2x32xf32>
    tpu.vector_store %arg3[%c0_9, %c0_10], %12 {strides = array<i32>} : memref<2x32xf32, #tpu.memory_space<vmem>>, vector<2x32xf32>,
    return
  }
}

</mosaic_0001>

<bundles_post_ra>
// kernel: vision_encoder.1
= control target key start
LH: loop header
LB: loop body
LE: loop exit
PB: predicated region body
PF: predicated region fallthrough
CT: control target
= control target key end

     0   :  { %8 = vsyncpa [#allocation3], 0  ;;  %s1997_s0 = inlined_call_operand.vmem [shape: f32[2,768], index: 0, kind: input, shape index: {}]   ;;  %s1998_s1 = inlined_call_operand.hbm [shape: f32[769,512], index: 1, kind: input, shape index: {}]   ;;  %s1999_s2 = inlined_call_operand.vmem [shape: f32[513,32], index: 2, kind: input, shape index: {}]   ;;  %s2000_s3 = inlined_call_operand.hbm [shape: f32[2,32], index: 3, kind: output, shape index: {}]  }
   0x1   :  { %9 = vsyncpa [#allocation4], 0  ;;  %s1713_s12 = smov [#allocation2]   ;;  %s1665_s16 = scalar_lea.hbm %s1998_s1, 49664 }
   0x2   :  { %s17_s13 = sshll.u32 %s1713_s12, 4  ;;  %p1666_p0 = scmp.ne.s32.totalorder %s1998_s1, %s1665_s16  ;;  %s18_s13 = int_to_ptr.vmem [resolvable:$true] %s17_s13 }
   0x3   :  { %p1669_p1 = scmp.lt.u32.totalorder %s1665_s16, %s1998_s1 }
   0x5   :  { %p1671_p2 = pnand %p1669_p1, %p1666_p0 }
   0x7   :  { %1674 = shalt.err (!%p1671_p2)
}
   0x8   :  { %s1675_s21 = scalar_lea.vmem %s18_s13, 49664  ;;  %p1680_p4 = scmp.lt.s32.totalorder %s18_s13, %s18_s13 }
   0x9   :  { %p1676_p3 = scmp.ne.s32.totalorder %s18_s13, %s1675_s21  ;;  %p1681_p5 = scmp.lt.s32.totalorder %s1675_s21, %s1675_s21 }
   0xb   :  { %p1682_p6 = por %p1681_p5, %p1680_p4 }
   0xd   :  { %p1683_p7 = pnand %p1682_p6, %p1676_p3 }
   0xf   :  { %1686 = shalt.err (!%p1683_p7)
}
  0x10   :  { %s1714_s22 = smov 512   ;;  %s1715_s23 = smov 32  }
  0x11   :  { %23 = dma.hbm_to_vmem [thread:$0]  %s1998_s1, 49664, %s18_s13, [#allocation3], %s1714_s22, %s1714_s22, %s1715_s23  }
  0x12   :  { %1709 = dma.done.wait [#allocation3], 49664  }
  0x13   :  { %1710 = vsyncadd [#allocation3], 4294917632  ;;  %v32_v0 = vld [vmem:[#allocation2 + $0x8] sm:$0xff]  ;;  %v34_v2 = vld [vmem:[#allocation2 + $0x18] sm:$0xff]  ;;  %s1717_s15 = smov [#allocation5]   ;;  %vm1110_vm0 = vcmask 254976  }
  0x14   :  { %v36_v1 = vld [vmem:[#allocation2 + $0x28] sm:$0xff]  ;;  %v38_v4 = vld [vmem:[#allocation2 + $0x38] sm:$0xff]  ;;  %v31_v5 = vld [vmem:[#allocation2] sm:$0xff]  ;;  %s1118_s16 = sshll.u32 %s1717_s15, 4  ;;  %s1119_s16 = int_to_ptr.vmem [resolvable:$true] %s1118_s16 }
  0x15   :  { %v1199_v3 = vpack.c.bf16 %v36_v1, %v32_v0  ;;  %v35_v6 = vld [vmem:[#allocation2 + $0x20] sm:$0xff]  ;;  %v1391_v7 = vpack.c.bf16 %v38_v4, %v34_v2  ;;  %v33_v9 = vld [vmem:[#allocation2 + $0x10] sm:$0xff]  ;;  %v40_v11 = vld [vmem:[#allocation2 + $0x48] sm:$0xff]  ;;  %s1687_s17 = scalar_lea.vmem %s1119_s16, 32  ;;  %p1692_p9 = scmp.lt.s32.totalorder %s1119_s16, %s1119_s16 }
  0x16   :  { %v1201_v8 = vpack.c.bf16 %v35_v6, %v31_v5  ;;  %v37_v10 = vld [vmem:[#allocation2 + $0x30] sm:$0xff]  ;;  %v44_v13 = vld [vmem:[#allocation2 + $0x68] sm:$0xff]  ;;  %v42_v14 = vld [vmem:[#allocation2 + $0x58] sm:$0xff]  ;;  %p1688_p8 = scmp.ne.s32.totalorder %s1119_s16, %s1687_s17  ;;  %p1693_p10 = scmp.lt.s32.totalorder %s1687_s17, %s1687_s17 }
  0x17   :  { %1200 = vmatprep.subr.bf16.mxu0 %v1199_v3  ;;  %v1393_v12 = vpack.c.bf16 %v37_v10, %v33_v9  ;;  %v46_v15 = vld [vmem:[#allocation2 + $0x78] sm:$0xff]  ;;  %1392 = vmatprep.subr.bf16.mxu1 %v1391_v7  ;;  %v1203_v16 = vpack.c.bf16 %v44_v13, %v40_v11  ;;  %v39_v18 = vld [vmem:[#allocation2 + $0x40] sm:$0xff]  ;;  %v41_v20 = vld [vmem:[#allocation2 + $0x50] sm:$0xff] }
  0x18   :  { %1202 = vmatpush1.bf16.msra.mxu0 %v1201_v8  ;;  %v1395_v17 = vpack.c.bf16 %v46_v15, %v42_v14  ;;  %v43_v19 = vld [vmem:[#allocation2 + $0x60] sm:$0xff]  ;;  %v45_v22 = vld [vmem:[#allocation2 + $0x70] sm:$0xff]  ;;  %v48_v23 = vld [vmem:[#allocation2 + $0x88] sm:$0xff]  ;;  %p1694_p11 = por %p1693_p10, %p1692_p9 }
  0x19   :  { %1394 = vmatpush1.bf16.msra.mxu1 %v1393_v12  ;;  %v1205_v21 = vpack.c.bf16 %v43_v19, %v39_v18  ;;  %v52_v24 = vld [vmem:[#allocation2 + $0xa8] sm:$0xff]  ;;  %1204 = vmatprep.subr.bf16.mxu0 %v1203_v16  ;;  %v1397_v25 = vpack.c.bf16 %v45_v22, %v41_v20  ;;  %v50_v27 = vld [vmem:[#allocation2 + $0x98] sm:$0xff]  ;;  %v47_v29 = vld [vmem:[#allocation2 + $0x80] sm:$0xff] }
  0x1a   :  { %1396 = vmatprep.subr.bf16.mxu1 %v1395_v17  ;;  %v1207_v26 = vpack.c.bf16 %v52_v24, %v48_v23  ;;  %v54_v28 = vld [vmem:[#allocation2 + $0xb8] sm:$0xff]  ;;  %v51_v31 = vld [vmem:[#allocation2 + $0xa0] sm:$0xff]  ;;  %v49_v32 = vld [vmem:[#allocation2 + $0x90] sm:$0xff]  ;;  %p1695_p12 = pnand %p1694_p11, %p1688_p8 }
  0x1b   :  { %v1399_v30 = vpack.c.bf16 %v54_v28, %v50_v27  ;;  %v53_v33 = vld [vmem:[#allocation2 + $0xb0] sm:$0xff]  ;;  %v1209_v34 = vpack.c.bf16 %v51_v31, %v47_v29  ;;  %v56_v35 = vld [vmem:[#allocation2 + $0xc8] sm:$0xff]  ;;  %v58_v37 = vld [vmem:[#allocation2 + $0xd8] sm:$0xff] }
  0x1c   :  { %1206 = vmatpush1.bf16.msra.mxu0 %v1205_v21  ;;  %v60_v36 = vld [vmem:[#allocation2 + $0xe8] sm:$0xff]  ;;  %v1401_v38 = vpack.c.bf16 %v53_v33, %v49_v32  ;;  %v62_v40 = vld [vmem:[#allocation2 + $0xf8] sm:$0xff]  ;;  %v55_v41 = vld [vmem:[#allocation2 + $0xc0] sm:$0xff] }
  0x1d   :  { %1398 = vmatpush1.bf16.msra.mxu1 %v1397_v25  ;;  %1208 = vmatprep.subr.bf16.mxu0 %v1207_v26  ;;  %v1211_v39 = vpack.c.bf16 %v60_v36, %v56_v35  ;;  %v59_v42 = vld [vmem:[#allocation2 + $0xe0] sm:$0xff]  ;;  %v1403_v43 = vpack.c.bf16 %v62_v40, %v58_v37  ;;  %v57_v44 = vld [vmem:[#allocation2 + $0xd0] sm:$0xff]  ;;  %v64_v46 = vld [vmem:[#allocation2 + $0x108] sm:$0xff] }
  0x1e   :  { %1400 = vmatprep.subr.bf16.mxu1 %v1399_v30  ;;  %v61_v45 = vld [vmem:[#allocation2 + $0xf0] sm:$0xff]  ;;  %v68_v47 = vld [vmem:[#allocation2 + $0x128] sm:$0xff]  ;;  %v66_v48 = vld [vmem:[#allocation2 + $0x118] sm:$0xff]  ;;  %v1213_v50 = vpack.c.bf16 %v59_v42, %v55_v41 }
  0x1f   :  { %v70_v49 = vld [vmem:[#allocation2 + $0x138] sm:$0xff]  ;;  %v1405_v51 = vpack.c.bf16 %v61_v45, %v57_v44  ;;  %v1215_v52 = vpack.c.bf16 %v68_v47, %v64_v46  ;;  %v63_v53 = vld [vmem:[#allocation2 + $0x100] sm:$0xff]  ;;  %v65_v55 = vld [vmem:[#allocation2 + $0x110] sm:$0xff]  ;;  %v418_v46 = vlaneseq  ;;  %v1716_v47 = vmov 1983009808  }
  0x20   :  { %1210 = vmatpush1.bf16.msra.mxu0 %v1209_v34  ;;  %v67_v54 = vld [vmem:[#allocation2 + $0x120] sm:$0xff]  ;;  %v1407_v56 = vpack.c.bf16 %v70_v49, %v66_v48  ;;  %v69_v57 = vld [vmem:[#allocation2 + $0x130] sm:$0xff]  ;;  %v72_v58 = vld [vmem:[#allocation2 + $0x148] sm:$0xff]  ;;  %v442_v48 = vunpack.c.l.s4 %v1716_v47 }
  0x21   :  { %1402 = vmatpush1.bf16.msra.mxu1 %v1401_v38  ;;  %1212 = vmatprep.subr.bf16.mxu0 %v1211_v39  ;;  %v76_v59 = vld [vmem:[#allocation2 + $0x168] sm:$0xff]  ;;  %v74_v60 = vld [vmem:[#allocation2 + $0x158] sm:$0xff]  ;;  %v1217_v62 = vpack.c.bf16 %v67_v54, %v63_v53  ;;  %v1409_v63 = vpack.c.bf16 %v69_v57, %v65_v55  ;;  %v71_v1 = vld [vmem:[#allocation2 + $0x140] sm:$0xff] }
  0x22   :  { %1404 = vmatprep.subr.bf16.mxu1 %v1403_v43  ;;  %v78_v61 = vld [vmem:[#allocation2 + $0x178] sm:$0xff]  ;;  %v1219_v0 = vpack.c.bf16 %v76_v59, %v72_v58  ;;  %v75_v2 = vld [vmem:[#allocation2 + $0x160] sm:$0xff]  ;;  %v73_v3 = vld [vmem:[#allocation2 + $0x150] sm:$0xff] }
  0x23   :  { %v1411_v4 = vpack.c.bf16 %v78_v61, %v74_v60  ;;  %v77_v5 = vld [vmem:[#allocation2 + $0x170] sm:$0xff]  ;;  %v80_v6 = vld [vmem:[#allocation2 + $0x188] sm:$0xff]  ;;  %v82_v8 = vld [vmem:[#allocation2 + $0x198] sm:$0xff]  ;;  %v1221_v10 = vpack.c.bf16 %v75_v2, %v71_v1  ;;  %v1750_v61 = vshrl.u32 %v418_v46, 7 }
  0x24   :  { %1214 = vmatpush1.bf16.msra.mxu0 %v1213_v50  ;;  %v84_v7 = vld [vmem:[#allocation2 + $0x1a8] sm:$0xff]  ;;  %v86_v9 = vld [vmem:[#allocation2 + $0x1b8] sm:$0xff]  ;;  %v1413_v11 = vpack.c.bf16 %v77_v5, %v73_v3  ;;  %v79_v13 = vld [vmem:[#allocation2 + $0x180] sm:$0xff] }
  0x25   :  { %1406 = vmatpush1.bf16.msra.mxu1 %v1405_v51  ;;  %1216 = vmatprep.subr.bf16.mxu0 %v1215_v52  ;;  %v1223_v12 = vpack.c.bf16 %v84_v7, %v80_v6  ;;  %v83_v14 = vld [vmem:[#allocation2 + $0x1a0] sm:$0xff]  ;;  %v81_v15 = vld [vmem:[#allocation2 + $0x190] sm:$0xff]  ;;  %v1415_v16 = vpack.c.bf16 %v86_v9, %v82_v8  ;;  %v88_v18 = vld [vmem:[#allocation2 + $0x1c8] sm:$0xff] }
  0x26   :  { %1408 = vmatprep.subr.bf16.mxu1 %v1407_v56  ;;  %v85_v17 = vld [vmem:[#allocation2 + $0x1b0] sm:$0xff]  ;;  %v92_v19 = vld [vmem:[#allocation2 + $0x1e8] sm:$0xff]  ;;  %v90_v20 = vld [vmem:[#allocation2 + $0x1d8] sm:$0xff]  ;;  %v1225_v22 = vpack.c.bf16 %v83_v14, %v79_v13 }
  0x27   :  { %v94_v21 = vld [vmem:[#allocation2 + $0x1f8] sm:$0xff]  ;;  %v1417_v23 = vpack.c.bf16 %v85_v17, %v81_v15  ;;  %v1227_v24 = vpack.c.bf16 %v92_v19, %v88_v18  ;;  %v87_v25 = vld [vmem:[#allocation2 + $0x1c0] sm:$0xff]  ;;  %v89_v27 = vld [vmem:[#allocation2 + $0x1d0] sm:$0xff] }
  0x28   :  { %1218 = vmatpush1.bf16.msra.mxu0 %v1217_v62  ;;  %v91_v26 = vld [vmem:[#allocation2 + $0x1e0] sm:$0xff]  ;;  %v1419_v28 = vpack.c.bf16 %v94_v21, %v90_v20  ;;  %v93_v29 = vld [vmem:[#allocation2 + $0x1f0] sm:$0xff]  ;;  %v96_v30 = vld [vmem:[#allocation2 + $0x208] sm:$0xff]  ;;  %v443_v62 = vunpack.c.0.s8 %v442_v48 }
  0x29   :  { %1410 = vmatpush1.bf16.msra.mxu1 %v1409_v63  ;;  %1220 = vmatprep.subr.bf16.mxu0 %v1219_v0  ;;  %v100_v31 = vld [vmem:[#allocation2 + $0x228] sm:$0xff]  ;;  %v98_v32 = vld [vmem:[#allocation2 + $0x218] sm:$0xff]  ;;  %v1229_v34 = vpack.c.bf16 %v91_v26, %v87_v25  ;;  %v1421_v35 = vpack.c.bf16 %v93_v29, %v89_v27  ;;  %v95_v37 = vld [vmem:[#allocation2 + $0x200] sm:$0xff] }
  0x2a   :  { %1412 = vmatprep.subr.bf16.mxu1 %v1411_v4  ;;  %v102_v33 = vld [vmem:[#allocation2 + $0x238] sm:$0xff]  ;;  %v1231_v36 = vpack.c.bf16 %v100_v31, %v96_v30  ;;  %v99_v38 = vld [vmem:[#allocation2 + $0x220] sm:$0xff]  ;;  %v97_v39 = vld [vmem:[#allocation2 + $0x210] sm:$0xff] }
  0x2b   :  { %v1423_v40 = vpack.c.bf16 %v102_v33, %v98_v32  ;;  %v101_v41 = vld [vmem:[#allocation2 + $0x230] sm:$0xff]  ;;  %v104_v42 = vld [vmem:[#allocation2 + $0x248] sm:$0xff]  ;;  %v106_v44 = vld [vmem:[#allocation2 + $0x258] sm:$0xff]  ;;  %v1233_v49 = vpack.c.bf16 %v99_v38, %v95_v37 }
  0x2c   :  { %1222 = vmatpush1.bf16.msra.mxu0 %v1221_v10  ;;  %v108_v43 = vld [vmem:[#allocation2 + $0x268] sm:$0xff]  ;;  %v110_v45 = vld [vmem:[#allocation2 + $0x278] sm:$0xff]  ;;  %v1425_v50 = vpack.c.bf16 %v101_v41, %v97_v39  ;;  %v103_v52 = vld [vmem:[#allocation2 + $0x240] sm:$0xff] }
  0x2d   :  { %1414 = vmatpush1.bf16.msra.mxu1 %v1413_v11  ;;  %1224 = vmatprep.subr.bf16.mxu0 %v1223_v12  ;;  %v1235_v51 = vpack.c.bf16 %v108_v43, %v104_v42  ;;  %v107_v53 = vld [vmem:[#allocation2 + $0x260] sm:$0xff]  ;;  %v105_v54 = vld [vmem:[#allocation2 + $0x250] sm:$0xff]  ;;  %v1427_v55 = vpack.c.bf16 %v110_v45, %v106_v44  ;;  %v112_v57 = vld [vmem:[#allocation2 + $0x288] sm:$0xff]  ;;  %v1753_v11 = vsub.s32 %v443_v62, %v1750_v61 }
  0x2e   :  { %1416 = vmatprep.subr.bf16.mxu1 %v1415_v16  ;;  %v109_v56 = vld [vmem:[#allocation2 + $0x270] sm:$0xff]  ;;  %v116_v58 = vld [vmem:[#allocation2 + $0x2a8] sm:$0xff]  ;;  %v114_v59 = vld [vmem:[#allocation2 + $0x298] sm:$0xff]  ;;  %v1237_v63 = vpack.c.bf16 %v107_v53, %v103_v52 }
  0x2f   :  { %v118_v60 = vld [vmem:[#allocation2 + $0x2b8] sm:$0xff]  ;;  %v1429_v0 = vpack.c.bf16 %v109_v56, %v105_v54  ;;  %v1239_v1 = vpack.c.bf16 %v116_v58, %v112_v57  ;;  %v111_v2 = vld [vmem:[#allocation2 + $0x280] sm:$0xff]  ;;  %v113_v4 = vld [vmem:[#allocation2 + $0x290] sm:$0xff] }
  0x30   :  { %1226 = vmatpush1.bf16.msra.mxu0 %v1225_v22  ;;  %v115_v3 = vld [vmem:[#allocation2 + $0x2a0] sm:$0xff]  ;;  %v1431_v5 = vpack.c.bf16 %v118_v60, %v114_v59  ;;  %v117_v6 = vld [vmem:[#allocation2 + $0x2b0] sm:$0xff]  ;;  %v120_v7 = vld [vmem:[#allocation2 + $0x2c8] sm:$0xff] }
  0x31   :  { %1418 = vmatpush1.bf16.msra.mxu1 %v1417_v23  ;;  %1228 = vmatprep.subr.bf16.mxu0 %v1227_v24  ;;  %v124_v8 = vld [vmem:[#allocation2 + $0x2e8] sm:$0xff]  ;;  %v122_v9 = vld [vmem:[#allocation2 + $0x2d8] sm:$0xff]  ;;  %v1241_v12 = vpack.c.bf16 %v115_v3, %v111_v2  ;;  %v119_v13 = vld [vmem:[#allocation2 + $0x2c0] sm:$0xff]  ;;  %v1433_v14 = vpack.c.bf16 %v117_v6, %v113_v4 }
  0x32   :  { %1420 = vmatprep.subr.bf16.mxu1 %v1419_v28  ;;  %v126_v10 = vld [vmem:[#allocation2 + $0x2f8] sm:$0xff]  ;;  %v1243_v15 = vpack.c.bf16 %v124_v8, %v120_v7  ;;  %v123_v16 = vld [vmem:[#allocation2 + $0x2e0] sm:$0xff]  ;;  %v121_v17 = vld [vmem:[#allocation2 + $0x2d0] sm:$0xff] }
  0x33   :  { %v125_v18 = vld [vmem:[#allocation2 + $0x2f0] sm:$0xff]  ;;  %v1435_v19 = vpack.c.bf16 %v126_v10, %v122_v9  ;;  %v128_v20 = vld [vmem:[#allocation2 + $0x308] sm:$0xff]  ;;  %v1758_v22 = vld [vmem:[%s1997_s0] sm:$0xff]  ;;  %v1245_v26 = vpack.c.bf16 %v123_v16, %v119_v13 }
  0x34   :  { %1230 = vmatpush1.bf16.msra.mxu0 %v1229_v34  ;;  %v132_v21 = vld [vmem:[#allocation2 + $0x328] sm:$0xff]  ;;  %v130_v23 = vld [vmem:[#allocation2 + $0x318] sm:$0xff]  ;;  %v1762_v25 = vrot.slane %v1758_v22, %v1753_v11  ;;  %v1437_v27 = vpack.c.bf16 %v125_v18, %v121_v17  ;;  %v127_v29 = vld [vmem:[#allocation2 + $0x300] sm:$0xff]  ;;  %v440_v8 = vcombine.high %v1758_v22, %v1758_v22 }
  0x35   :  { %1422 = vmatpush1.bf16.msra.mxu1 %v1421_v35  ;;  %1232 = vmatprep.subr.bf16.mxu0 %v1231_v36  ;;  %v134_v24 = vld [vmem:[#allocation2 + $0x338] sm:$0xff]  ;;  %v1247_v28 = vpack.c.bf16 %v132_v21, %v128_v20  ;;  %v131_v30 = vld [vmem:[#allocation2 + $0x320] sm:$0xff]  ;;  %v129_v31 = vld [vmem:[#allocation2 + $0x310] sm:$0xff] }
  0x36   :  { %1424 = vmatprep.subr.bf16.mxu1 %v1423_v40  ;;  %v455_v32 = vcombine.high %v1762_v25, %v1762_v25  ;;  %v1439_v33 = vpack.c.bf16 %v134_v24, %v130_v23  ;;  %v133_v34 = vld [vmem:[#allocation2 + $0x330] sm:$0xff]  ;;  %v136_v35 = vld [vmem:[#allocation2 + $0x348] sm:$0xff]  ;;  %v138_v37 = vld [vmem:[#allocation2 + $0x358] sm:$0xff]  ;;  %v1249_v39 = vpack.c.bf16 %v131_v30, %v127_v29  ;;  %v1769_v22 = vrot.slane %v440_v8, %v1753_v11 }
  0x37   :  { %v140_v36 = vld [vmem:[#allocation2 + $0x368] sm:$0xff]  ;;  %v142_v38 = vld [vmem:[#allocation2 + $0x378] sm:$0xff]  ;;  %v1441_v40 = vpack.c.bf16 %v133_v34, %v129_v31  ;;  %v135_v42 = vld [vmem:[#allocation2 + $0x340] sm:$0xff] }
  0x38   :  { %1234 = vmatpush1.bf16.msra.mxu0 %v1233_v49  ;;  %535 = vmatprep.mubr.f32.mxu0 %v455_v32  ;;  %v1251_v41 = vpack.c.bf16 %v140_v36, %v136_v35  ;;  %v139_v43 = vld [vmem:[#allocation2 + $0x360] sm:$0xff]  ;;  %v137_v44 = vld [vmem:[#allocation2 + $0x350] sm:$0xff]  ;;  %v1443_v45 = vpack.c.bf16 %v142_v38, %v138_v37  ;;  %v144_v47 = vld [vmem:[#allocation2 + $0x388] sm:$0xff]  ;;  %v456_v11 = vcombine.high %v1769_v22, %v1769_v22 }
  0x39   :  { %1426 = vmatpush1.bf16.msra.mxu1 %v1425_v50  ;;  %1236 = vmatprep.subr.bf16.mxu0 %v1235_v51  ;;  %v141_v46 = vld [vmem:[#allocation2 + $0x370] sm:$0xff]  ;;  %v148_v48 = vld [vmem:[#allocation2 + $0x3a8] sm:$0xff]  ;;  %v146_v49 = vld [vmem:[#allocation2 + $0x398] sm:$0xff]  ;;  %v1253_v51 = vpack.c.bf16 %v139_v43, %v135_v42 }
  0x3a   :  { %1428 = vmatprep.subr.bf16.mxu1 %v1427_v55  ;;  %748 = vmatprep.mubr.f32.mxu1 %v455_v32  ;;  %v150_v50 = vld [vmem:[#allocation2 + $0x3b8] sm:$0xff]  ;;  %v1445_v52 = vpack.c.bf16 %v141_v46, %v137_v44  ;;  %v1255_v53 = vpack.c.bf16 %v148_v48, %v144_v47  ;;  %v143_v54 = vld [vmem:[#allocation2 + $0x380] sm:$0xff]  ;;  %v145_v56 = vld [vmem:[#allocation2 + $0x390] sm:$0xff] }
  0x3b   :  { %v147_v55 = vld [vmem:[#allocation2 + $0x3a0] sm:$0xff]  ;;  %v1447_v57 = vpack.c.bf16 %v150_v50, %v146_v49  ;;  %v149_v58 = vld [vmem:[#allocation2 + $0x3b0] sm:$0xff]  ;;  %v152_v59 = vld [vmem:[#allocation2 + $0x3c8] sm:$0xff] }
  0x3c   :  { %1238 = vmatpush1.bf16.msra.mxu0 %v1237_v63  ;;  %v156_v60 = vld [vmem:[#allocation2 + $0x3e8] sm:$0xff]  ;;  %v154_v62 = vld [vmem:[#allocation2 + $0x3d8] sm:$0xff]  ;;  %v151_v3 = vld [vmem:[#allocation2 + $0x3c0] sm:$0xff] }
  0x3d   :  { %1430 = vmatpush1.bf16.msra.mxu1 %v1429_v0  ;;  %1240 = vmatprep.subr.bf16.mxu0 %v1239_v1  ;;  %v158_v63 = vld [vmem:[#allocation2 + $0x3f8] sm:$0xff]  ;;  %v1257_v0 = vpack.c.bf16 %v147_v55, %v143_v54  ;;  %v1449_v1 = vpack.c.bf16 %v149_v58, %v145_v56  ;;  %v1259_v2 = vpack.c.bf16 %v156_v60, %v152_v59  ;;  %v155_v4 = vld [vmem:[#allocation2 + $0x3e0] sm:$0xff]  ;;  %v157_v7 = vld [vmem:[#allocation2 + $0x3f0] sm:$0xff] }
  0x3e   :  { %1432 = vmatprep.subr.bf16.mxu1 %v1431_v5  ;;  %v153_v5 = vld [vmem:[#allocation2 + $0x3d0] sm:$0xff]  ;;  %v1451_v6 = vpack.c.bf16 %v158_v63, %v154_v62  ;;  %v160_v9 = vld [vmem:[#allocation2 + $0x408] sm:$0xff]  ;;  %v166_v13 = vld [vmem:[#allocation2 + $0x438] sm:$0xff] }
  0x3f   :  { %v164_v10 = vld [vmem:[#allocation2 + $0x428] sm:$0xff]  ;;  %v159_v17 = vld [vmem:[#allocation2 + $0x400] sm:$0xff]  ;;  %v165_v21 = vld [vmem:[#allocation2 + $0x430] sm:$0xff] }
  0x40   :  { %1242 = vmatpush1.bf16.msra.mxu0 %v1241_v12  ;;  %v162_v12 = vld [vmem:[#allocation2 + $0x418] sm:$0xff]  ;;  %v1263_v16 = vpack.c.bf16 %v164_v10, %v160_v9  ;;  %v163_v18 = vld [vmem:[#allocation2 + $0x420] sm:$0xff]  ;;  %v168_v23 = vld [vmem:[#allocation2 + $0x448] sm:$0xff] }
  0x41   :  { %1434 = vmatpush1.bf16.msra.mxu1 %v1433_v14  ;;  %1244 = vmatprep.subr.bf16.mxu0 %v1243_v15  ;;  %v1261_v14 = vpack.c.bf16 %v155_v4, %v151_v3  ;;  %v1453_v15 = vpack.c.bf16 %v157_v7, %v153_v5  ;;  %v1455_v20 = vpack.c.bf16 %v166_v13, %v162_v12  ;;  %v172_v24 = vld [vmem:[#allocation2 + $0x468] sm:$0xff]  ;;  %v167_v31 = vld [vmem:[#allocation2 + $0x440] sm:$0xff]  ;;  %v173_v35 = vld [vmem:[#allocation2 + $0x470] sm:$0xff] }
  0x42   :  { %1436 = vmatprep.subr.bf16.mxu1 %v1435_v19  ;;  %v161_v19 = vld [vmem:[#allocation2 + $0x410] sm:$0xff]  ;;  %v1267_v30 = vpack.c.bf16 %v172_v24, %v168_v23  ;;  %v171_v32 = vld [vmem:[#allocation2 + $0x460] sm:$0xff]  ;;  %v176_v36 = vld [vmem:[#allocation2 + $0x488] sm:$0xff] }
  0x43   :  { %v1457_v29 = vpack.c.bf16 %v165_v21, %v161_v19  ;;  %v180_v37 = vld [vmem:[#allocation2 + $0x4a8] sm:$0xff]  ;;  %v178_v38 = vld [vmem:[#allocation2 + $0x498] sm:$0xff]  ;;  %v175_v43 = vld [vmem:[#allocation2 + $0x480] sm:$0xff] }
  0x44   :  { %1246 = vmatpush1.bf16.msra.mxu0 %v1245_v26  ;;  %v170_v26 = vld [vmem:[#allocation2 + $0x458] sm:$0xff]  ;;  %v1271_v42 = vpack.c.bf16 %v180_v37, %v176_v36  ;;  %v179_v44 = vld [vmem:[#allocation2 + $0x4a0] sm:$0xff]  ;;  %v181_v47 = vld [vmem:[#allocation2 + $0x4b0] sm:$0xff] }
  0x45   :  { %1438 = vmatpush1.bf16.msra.mxu1 %v1437_v27  ;;  %1248 = vmatprep.subr.bf16.mxu0 %v1247_v28  ;;  %v174_v27 = vld [vmem:[#allocation2 + $0x478] sm:$0xff]  ;;  %v1265_v28 = vpack.c.bf16 %v163_v18, %v159_v17  ;;  %v184_v48 = vld [vmem:[#allocation2 + $0x4c8] sm:$0xff]  ;;  %v183_v54 = vld [vmem:[#allocation2 + $0x4c0] sm:$0xff] }
  0x46   :  { %1440 = vmatprep.subr.bf16.mxu1 %v1439_v33  ;;  %v169_v33 = vld [vmem:[#allocation2 + $0x450] sm:$0xff]  ;;  %v1459_v34 = vpack.c.bf16 %v174_v27, %v170_v26  ;;  %v188_v49 = vld [vmem:[#allocation2 + $0x4e8] sm:$0xff]  ;;  %v186_v50 = vld [vmem:[#allocation2 + $0x4d8] sm:$0xff] }
  0x47   :  { %v187_v55 = vld [vmem:[#allocation2 + $0x4e0] sm:$0xff]  ;;  %v185_v56 = vld [vmem:[#allocation2 + $0x4d0] sm:$0xff]  ;;  %v192_v59 = vld [vmem:[#allocation2 + $0x508] sm:$0xff] }
  0x48   :  { %1250 = vmatpush1.bf16.msra.mxu0 %v1249_v39  ;;  %v182_v39 = vld [vmem:[#allocation2 + $0x4b8] sm:$0xff]  ;;  %v189_v58 = vld [vmem:[#allocation2 + $0x4f0] sm:$0xff]  ;;  %v196_v60 = vld [vmem:[#allocation2 + $0x528] sm:$0xff] }
  0x49   :  { %1442 = vmatpush1.bf16.msra.mxu1 %v1441_v40  ;;  %1252 = vmatprep.subr.bf16.mxu0 %v1251_v41  ;;  %v1269_v40 = vpack.c.bf16 %v171_v32, %v167_v31  ;;  %v1461_v41 = vpack.c.bf16 %v173_v35, %v169_v33  ;;  %v1463_v46 = vpack.c.bf16 %v182_v39, %v178_v38  ;;  %v194_v62 = vld [vmem:[#allocation2 + $0x518] sm:$0xff]  ;;  %v191_v3 = vld [vmem:[#allocation2 + $0x500] sm:$0xff]  ;;  %v193_v5 = vld [vmem:[#allocation2 + $0x510] sm:$0xff] }
  0x4a   :  { %1444 = vmatprep.subr.bf16.mxu1 %v1443_v45  ;;  %v177_v45 = vld [vmem:[#allocation2 + $0x490] sm:$0xff]  ;;  %v198_v63 = vld [vmem:[#allocation2 + $0x538] sm:$0xff]  ;;  %v195_v4 = vld [vmem:[#allocation2 + $0x520] sm:$0xff] }
  0x4b   :  { %v197_v7 = vld [vmem:[#allocation2 + $0x530] sm:$0xff]  ;;  %v200_v8 = vld [vmem:[#allocation2 + $0x548] sm:$0xff]  ;;  %v202_v10 = vld [vmem:[#allocation2 + $0x558] sm:$0xff]  ;;  %v1281_v13 = vpack.c.bf16 %v195_v4, %v191_v3 }
  0x4c   :  { %1254 = vmatpush1.bf16.msra.mxu0 %v1253_v51  ;;  %v190_v51 = vld [vmem:[#allocation2 + $0x4f8] sm:$0xff]  ;;  %v204_v9 = vld [vmem:[#allocation2 + $0x568] sm:$0xff]  ;;  %v203_v17 = vld [vmem:[#allocation2 + $0x560] sm:$0xff] }
  0x4d   :  { %1446 = vmatpush1.bf16.msra.mxu1 %v1445_v52  ;;  %1256 = vmatprep.subr.bf16.mxu0 %v1255_v53  ;;  %v1273_v52 = vpack.c.bf16 %v179_v44, %v175_v43  ;;  %v1275_v53 = vpack.c.bf16 %v188_v49, %v184_v48  ;;  %v206_v12 = vld [vmem:[#allocation2 + $0x578] sm:$0xff]  ;;  %v201_v18 = vld [vmem:[#allocation2 + $0x550] sm:$0xff]  ;;  %v208_v21 = vld [vmem:[#allocation2 + $0x588] sm:$0xff] }
  0x4e   :  { %1448 = vmatprep.subr.bf16.mxu1 %v1447_v57  ;;  %v1467_v57 = vpack.c.bf16 %v190_v51, %v186_v50  ;;  %v1475_v19 = vpack.c.bf16 %v206_v12, %v202_v10  ;;  %v212_v23 = vld [vmem:[#allocation2 + $0x5a8] sm:$0xff]  ;;  %v210_v24 = vld [vmem:[#allocation2 + $0x598] sm:$0xff]  ;;  %v211_v31 = vld [vmem:[#allocation2 + $0x5a0] sm:$0xff] }
  0x4f   :  { %v214_v26 = vld [vmem:[#allocation2 + $0x5b8] sm:$0xff]  ;;  %v209_v32 = vld [vmem:[#allocation2 + $0x590] sm:$0xff]  ;;  %v216_v35 = vld [vmem:[#allocation2 + $0x5c8] sm:$0xff] }
  0x50   :  { %1258 = vmatpush1.bf16.msra.mxu0 %v1257_v0  ;;  %v1277_v0 = vpack.c.bf16 %v187_v55, %v183_v54  ;;  %v1479_v33 = vpack.c.bf16 %v214_v26, %v210_v24  ;;  %v220_v36 = vld [vmem:[#allocation2 + $0x5e8] sm:$0xff]  ;;  %v218_v37 = vld [vmem:[#allocation2 + $0x5d8] sm:$0xff]  ;;  %v217_v43 = vld [vmem:[#allocation2 + $0x5d0] sm:$0xff] }
  0x51   :  { %1450 = vmatpush1.bf16.msra.mxu1 %v1449_v1  ;;  %1260 = vmatprep.subr.bf16.mxu0 %v1259_v2  ;;  %v1469_v1 = vpack.c.bf16 %v189_v58, %v185_v56  ;;  %v1279_v2 = vpack.c.bf16 %v196_v60, %v192_v59  ;;  %v226_v48 = vld [vmem:[#allocation2 + $0x618] sm:$0xff]  ;;  %v225_v54 = vld [vmem:[#allocation2 + $0x610] sm:$0xff]  ;;  %v236_v58 = vld [vmem:[#allocation2 + $0x668] sm:$0xff] }
  0x52   :  { %1452 = vmatprep.subr.bf16.mxu1 %v1451_v6  ;;  %v1471_v6 = vpack.c.bf16 %v198_v63, %v194_v62  ;;  %v230_v49 = vld [vmem:[#allocation2 + $0x638] sm:$0xff]  ;;  %v229_v56 = vld [vmem:[#allocation2 + $0x630] sm:$0xff] }
  0x53   :  { %v1487_v55 = vpack.c.bf16 %v230_v49, %v226_v48  ;;  %v234_v59 = vld [vmem:[#allocation2 + $0x658] sm:$0xff]  ;;  %v1489_v63 = vpack.c.bf16 %v229_v56, %v225_v54  ;;  %v233_v3 = vld [vmem:[#allocation2 + $0x650] sm:$0xff]  ;;  %v276_v56 = vld [vmem:[#allocation2 + $0x7a8] sm:$0xff] }
  0x54   :  { %1262 = vmatpush1.bf16.msra.mxu0 %v1261_v14  ;;  %v1473_v14 = vpack.c.bf16 %v197_v7, %v193_v5  ;;  %v238_v60 = vld [vmem:[#allocation2 + $0x678] sm:$0xff]  ;;  %v237_v5 = vld [vmem:[#allocation2 + $0x670] sm:$0xff]  ;;  %v244_v7 = vld [vmem:[#allocation2 + $0x6a8] sm:$0xff] }
  0x55   :  { %1454 = vmatpush1.bf16.msra.mxu1 %v1453_v15  ;;  %1264 = vmatprep.subr.bf16.mxu0 %v1263_v16  ;;  %v1283_v15 = vpack.c.bf16 %v204_v9, %v200_v8  ;;  %v199_v16 = vld [vmem:[#allocation2 + $0x540] sm:$0xff]  ;;  %v1491_v4 = vpack.c.bf16 %v238_v60, %v234_v59  ;;  %v242_v8 = vld [vmem:[#allocation2 + $0x698] sm:$0xff]  ;;  %v1493_v12 = vpack.c.bf16 %v237_v5, %v233_v3  ;;  %v269_v54 = vld [vmem:[#allocation2 + $0x770] sm:$0xff] }
  0x56   :  { %1456 = vmatprep.subr.bf16.mxu1 %v1455_v20  ;;  %v205_v20 = vld [vmem:[#allocation2 + $0x570] sm:$0xff]  ;;  %v1285_v27 = vpack.c.bf16 %v203_v17, %v199_v16  ;;  %v246_v9 = vld [vmem:[#allocation2 + $0x6b8] sm:$0xff]  ;;  %v284_v5 = vld [vmem:[#allocation2 + $0x7e8] sm:$0xff] }
  0x57   :  { %536 = vmatmul.mubr.f32.vlgmr.msra.gmra.mrb[0].mxu0 %v1762_v25  ;;  %v241_v16 = vld [vmem:[#allocation2 + $0x690] sm:$0xff]  ;;  %v1495_v17 = vpack.c.bf16 %v246_v9, %v242_v8 }
  0x58   :  { %1266 = vmatpush1.bf16.msra.mxu0 %v1265_v28  ;;  %749 = vmatmul.mubr.f32.vlgmr.msra.gmra.mrb[0].mxu1 %v1762_v25  ;;  %v1465_v25 = vpack.c.bf16 %v181_v47, %v177_v45  ;;  %v1477_v28 = vpack.c.bf16 %v205_v20, %v201_v18  ;;  %v221_v45 = vld [vmem:[#allocation2 + $0x5f0] sm:$0xff]  ;;  %v228_v47 = vld [vmem:[#allocation2 + $0x628] sm:$0xff] }
  0x59   :  { %1458 = vmatpush1.bf16.msra.mxu1 %v1457_v29  ;;  %1268 = vmatprep.subr.bf16.mxu0 %v1267_v30  ;;  %v1287_v29 = vpack.c.bf16 %v212_v23, %v208_v21  ;;  %v207_v30 = vld [vmem:[#allocation2 + $0x580] sm:$0xff]  ;;  %v1485_v51 = vpack.c.bf16 %v221_v45, %v217_v43  ;;  %v245_v18 = vld [vmem:[#allocation2 + $0x6b0] sm:$0xff]  ;;  %v252_v20 = vld [vmem:[#allocation2 + $0x6e8] sm:$0xff] }
  0x5a   :  { %1460 = vmatprep.subr.bf16.mxu1 %v1459_v34  ;;  %606 = vmatprep.mubr.f32.mxu0 %v456_v11  ;;  %v213_v34 = vld [vmem:[#allocation2 + $0x5b0] sm:$0xff]  ;;  %v1289_v38 = vpack.c.bf16 %v211_v31, %v207_v30  ;;  %v250_v21 = vld [vmem:[#allocation2 + $0x6d8] sm:$0xff]  ;;  %v1497_v26 = vpack.c.bf16 %v245_v18, %v241_v16  ;;  %v268_v45 = vld [vmem:[#allocation2 + $0x768] sm:$0xff] }
  0x5b   :  { %819 = vmatprep.mubr.f32.mxu1 %v456_v11  ;;  %v222_v11 = vld [vmem:[#allocation2 + $0x5f8] sm:$0xff]  ;;  %v1481_v39 = vpack.c.bf16 %v213_v34, %v209_v32  ;;  %v249_v30 = vld [vmem:[#allocation2 + $0x6d0] sm:$0xff]  ;;  %v260_v34 = vld [vmem:[#allocation2 + $0x728] sm:$0xff] }
  0x5c   :  { %1270 = vmatpush1.bf16.msra.mxu0 %v1269_v40  ;;  %v1291_v40 = vpack.c.bf16 %v220_v36, %v216_v35  ;;  %v1483_v44 = vpack.c.bf16 %v222_v11, %v218_v37  ;;  %v254_v23 = vld [vmem:[#allocation2 + $0x6f8] sm:$0xff]  ;;  %v253_v32 = vld [vmem:[#allocation2 + $0x6f0] sm:$0xff]  ;;  %v292_v18 = vld [vmem:[#allocation2 + $0x828] sm:$0xff] }
  0x5d   :  { %1462 = vmatpush1.bf16.msra.mxu1 %v1461_v41  ;;  %1272 = vmatprep.subr.bf16.mxu0 %v1271_v42  ;;  %v215_v41 = vld [vmem:[#allocation2 + $0x5c0] sm:$0xff]  ;;  %v1499_v31 = vpack.c.bf16 %v254_v23, %v250_v21  ;;  %v258_v35 = vld [vmem:[#allocation2 + $0x718] sm:$0xff]  ;;  %v1501_v11 = vpack.c.bf16 %v253_v32, %v249_v30  ;;  %v261_v43 = vld [vmem:[#allocation2 + $0x730] sm:$0xff] }
  0x5e   :  { %1464 = vmatprep.subr.bf16.mxu1 %v1463_v46  ;;  %v219_v42 = vld [vmem:[#allocation2 + $0x5e0] sm:$0xff]  ;;  %v224_v46 = vld [vmem:[#allocation2 + $0x608] sm:$0xff]  ;;  %v262_v36 = vld [vmem:[#allocation2 + $0x738] sm:$0xff] }
  0x5f   :  { %v1293_v50 = vpack.c.bf16 %v219_v42, %v215_v41  ;;  %v257_v41 = vld [vmem:[#allocation2 + $0x710] sm:$0xff]  ;;  %v1503_v42 = vpack.c.bf16 %v262_v36, %v258_v35  ;;  %v300_v32 = vld [vmem:[#allocation2 + $0x868] sm:$0xff] }
  0x60   :  { %1274 = vmatpush1.bf16.msra.mxu0 %v1273_v52  ;;  %v1295_v52 = vpack.c.bf16 %v228_v47, %v224_v46  ;;  %v266_v46 = vld [vmem:[#allocation2 + $0x758] sm:$0xff]  ;;  %v1505_v49 = vpack.c.bf16 %v261_v43, %v257_v41  ;;  %v277_v3 = vld [vmem:[#allocation2 + $0x7b0] sm:$0xff]  ;;  %v1778_v36 = vld.sshfl [vmem:[%s1997_s0 + $0x8] sm:$0x33 pattern:$0x76325410] }
  0x61   :  { %1466 = vmatpush1.bf16.msra.mxu1 %v1465_v25  ;;  %1276 = vmatprep.subr.bf16.mxu0 %v1275_v53  ;;  %v223_v25 = vld [vmem:[#allocation2 + $0x600] sm:$0xff]  ;;  %v270_v47 = vld [vmem:[#allocation2 + $0x778] sm:$0xff]  ;;  %v285_v16 = vld [vmem:[#allocation2 + $0x7f0] sm:$0xff] }
  0x62   :  { %1468 = vmatprep.subr.bf16.mxu1 %v1467_v57  ;;  %v227_v53 = vld [vmem:[#allocation2 + $0x620] sm:$0xff]  ;;  %v232_v57 = vld [vmem:[#allocation2 + $0x648] sm:$0xff]  ;;  %v293_v30 = vld [vmem:[#allocation2 + $0x830] sm:$0xff] }
  0x63   :  { %v1297_v62 = vpack.c.bf16 %v227_v53, %v223_v25  ;;  %v265_v25 = vld [vmem:[#allocation2 + $0x750] sm:$0xff]  ;;  %v1507_v53 = vpack.c.bf16 %v270_v47, %v266_v46  ;;  %v304_v43 = vld [vmem:[#allocation2 + $0x888] sm:$0xff]  ;;  %v306_v46 = vld [vmem:[#allocation2 + $0x898] sm:$0xff] }
  0x64   :  { %1278 = vmatpush1.bf16.msra.mxu0 %v1277_v0  ;;  %v1299_v0 = vpack.c.bf16 %v236_v58, %v232_v57  ;;  %v274_v57 = vld [vmem:[#allocation2 + $0x798] sm:$0xff]  ;;  %v1509_v60 = vpack.c.bf16 %v269_v54, %v265_v25  ;;  %v305_v25 = vld [vmem:[#allocation2 + $0x890] sm:$0xff] }
  0x65   :  { %1470 = vmatpush1.bf16.msra.mxu1 %v1469_v1  ;;  %1280 = vmatprep.subr.bf16.mxu0 %v1279_v2  ;;  %v231_v1 = vld [vmem:[#allocation2 + $0x640] sm:$0xff]  ;;  %v278_v58 = vld [vmem:[#allocation2 + $0x7b8] sm:$0xff]  ;;  %v309_v54 = vld [vmem:[#allocation2 + $0x8b0] sm:$0xff] }
  0x66   :  { %1472 = vmatprep.subr.bf16.mxu1 %v1471_v6  ;;  %v235_v2 = vld [vmem:[#allocation2 + $0x660] sm:$0xff]  ;;  %v240_v6 = vld [vmem:[#allocation2 + $0x688] sm:$0xff]  ;;  %v310_v47 = vld [vmem:[#allocation2 + $0x8b8] sm:$0xff] }
  0x67   :  { %v1301_v10 = vpack.c.bf16 %v235_v2, %v231_v1  ;;  %v273_v1 = vld [vmem:[#allocation2 + $0x790] sm:$0xff]  ;;  %v1511_v2 = vpack.c.bf16 %v278_v58, %v274_v57  ;;  %v314_v57 = vld [vmem:[#allocation2 + $0x8d8] sm:$0xff] }
  0x68   :  { %1282 = vmatpush1.bf16.msra.mxu0 %v1281_v13  ;;  %v1303_v13 = vpack.c.bf16 %v244_v7, %v240_v6  ;;  %v282_v6 = vld [vmem:[#allocation2 + $0x7d8] sm:$0xff]  ;;  %v1513_v9 = vpack.c.bf16 %v277_v3, %v273_v1  ;;  %v320_v3 = vld [vmem:[#allocation2 + $0x908] sm:$0xff] }
  0x69   :  { %1474 = vmatpush1.bf16.msra.mxu1 %v1473_v14  ;;  %1284 = vmatprep.subr.bf16.mxu0 %v1283_v15  ;;  %v239_v14 = vld [vmem:[#allocation2 + $0x680] sm:$0xff]  ;;  %v286_v7 = vld [vmem:[#allocation2 + $0x7f8] sm:$0xff] }
  0x6a   :  { %1476 = vmatprep.subr.bf16.mxu1 %v1475_v19  ;;  %v243_v15 = vld [vmem:[#allocation2 + $0x6a0] sm:$0xff]  ;;  %v248_v19 = vld [vmem:[#allocation2 + $0x6c8] sm:$0xff]  ;;  %v318_v58 = vld [vmem:[#allocation2 + $0x8f8] sm:$0xff] }
  0x6b   :  { %v1305_v24 = vpack.c.bf16 %v243_v15, %v239_v14  ;;  %v281_v14 = vld [vmem:[#allocation2 + $0x7d0] sm:$0xff]  ;;  %v1515_v15 = vpack.c.bf16 %v286_v7, %v282_v6  ;;  %v1531_v1 = vpack.c.bf16 %v318_v58, %v314_v57  ;;  %v326_v6 = vld [vmem:[#allocation2 + $0x938] sm:$0xff] }
  0x6c   :  { %1286 = vmatpush1.bf16.msra.mxu0 %v1285_v27  ;;  %v1307_v27 = vpack.c.bf16 %v252_v20, %v248_v19  ;;  %v290_v19 = vld [vmem:[#allocation2 + $0x818] sm:$0xff]  ;;  %v1517_v23 = vpack.c.bf16 %v285_v16, %v281_v14  ;;  %v328_v16 = vld [vmem:[#allocation2 + $0x948] sm:$0xff] }
  0x6d   :  { %1478 = vmatpush1.bf16.msra.mxu1 %v1477_v28  ;;  %1288 = vmatprep.subr.bf16.mxu0 %v1287_v29  ;;  %v247_v28 = vld [vmem:[#allocation2 + $0x6c0] sm:$0xff]  ;;  %v294_v20 = vld [vmem:[#allocation2 + $0x838] sm:$0xff] }
  0x6e   :  { %1480 = vmatprep.subr.bf16.mxu1 %v1479_v33  ;;  %v251_v29 = vld [vmem:[#allocation2 + $0x6e0] sm:$0xff]  ;;  %v256_v33 = vld [vmem:[#allocation2 + $0x708] sm:$0xff] }
  0x6f   :  { %v1309_v37 = vpack.c.bf16 %v251_v29, %v247_v28  ;;  %v289_v28 = vld [vmem:[#allocation2 + $0x810] sm:$0xff]  ;;  %v1519_v29 = vpack.c.bf16 %v294_v20, %v290_v19  ;;  %v334_v19 = vld [vmem:[#allocation2 + $0x978] sm:$0xff] }
  0x70   :  { %1290 = vmatpush1.bf16.msra.mxu0 %v1289_v38  ;;  %v1311_v38 = vpack.c.bf16 %v260_v34, %v256_v33  ;;  %v298_v33 = vld [vmem:[#allocation2 + $0x858] sm:$0xff] }
  0x71   :  { %1482 = vmatpush1.bf16.msra.mxu1 %v1481_v39  ;;  %1292 = vmatprep.subr.bf16.mxu0 %v1291_v40  ;;  %v255_v39 = vld [vmem:[#allocation2 + $0x700] sm:$0xff]  ;;  %v302_v34 = vld [vmem:[#allocation2 + $0x878] sm:$0xff] }
  0x72   :  { %1484 = vmatprep.subr.bf16.mxu1 %v1483_v44  ;;  %v259_v40 = vld [vmem:[#allocation2 + $0x720] sm:$0xff]  ;;  %v264_v44 = vld [vmem:[#allocation2 + $0x748] sm:$0xff]  ;;  %v1523_v41 = vpack.c.bf16 %v302_v34, %v298_v33  ;;  %v342_v33 = vld [vmem:[#allocation2 + $0x9b8] sm:$0xff] }
  0x73   :  { %v1313_v48 = vpack.c.bf16 %v259_v40, %v255_v39  ;;  %v299_v39 = vld [vmem:[#allocation2 + $0x860] sm:$0xff]  ;;  %v297_v40 = vld [vmem:[#allocation2 + $0x850] sm:$0xff] }
  0x74   :  { %1294 = vmatpush1.bf16.msra.mxu0 %v1293_v50  ;;  %v1315_v50 = vpack.c.bf16 %v268_v45, %v264_v44  ;;  %v308_v44 = vld [vmem:[#allocation2 + $0x8a8] sm:$0xff]  ;;  %v464_v45 = vcombine.high %v1778_v36, %v1778_v36 }
  0x75   :  { %1486 = vmatpush1.bf16.msra.mxu1 %v1485_v51  ;;  %1296 = vmatprep.subr.bf16.mxu0 %v1295_v52  ;;  %v263_v51 = vld [vmem:[#allocation2 + $0x740] sm:$0xff] }
  0x76   :  { %1488 = vmatprep.subr.bf16.mxu1 %v1487_v55  ;;  %v267_v52 = vld [vmem:[#allocation2 + $0x760] sm:$0xff]  ;;  %v272_v55 = vld [vmem:[#allocation2 + $0x788] sm:$0xff] }
  0x77   :  { %v1317_v59 = vpack.c.bf16 %v267_v52, %v263_v51  ;;  %v303_v51 = vld [vmem:[#allocation2 + $0x880] sm:$0xff] }
  0x78   :  { %1298 = vmatpush1.bf16.msra.mxu0 %v1297_v62  ;;  %v1319_v62 = vpack.c.bf16 %v276_v56, %v272_v55  ;;  %v307_v52 = vld [vmem:[#allocation2 + $0x8a0] sm:$0xff]  ;;  %v312_v55 = vld [vmem:[#allocation2 + $0x8c8] sm:$0xff] }
  0x79   :  { %1490 = vmatpush1.bf16.msra.mxu1 %v1489_v63  ;;  %1300 = vmatprep.subr.bf16.mxu0 %v1299_v0  ;;  %v271_v63 = vld [vmem:[#allocation2 + $0x780] sm:$0xff]  ;;  %v316_v56 = vld [vmem:[#allocation2 + $0x8e8] sm:$0xff] }
  0x7a   :  { %1492 = vmatprep.subr.bf16.mxu1 %v1491_v4  ;;  %v275_v0 = vld [vmem:[#allocation2 + $0x7a0] sm:$0xff]  ;;  %v280_v4 = vld [vmem:[#allocation2 + $0x7c8] sm:$0xff] }
  0x7b   :  { %v1321_v8 = vpack.c.bf16 %v275_v0, %v271_v63  ;;  %v315_v63 = vld [vmem:[#allocation2 + $0x8e0] sm:$0xff]  ;;  %v313_v0 = vld [vmem:[#allocation2 + $0x8d0] sm:$0xff] }
  0x7c   :  { %1302 = vmatpush1.bf16.msra.mxu0 %v1301_v10  ;;  %v1323_v10 = vpack.c.bf16 %v284_v5, %v280_v4  ;;  %v324_v4 = vld [vmem:[#allocation2 + $0x928] sm:$0xff]  ;;  %v322_v5 = vld [vmem:[#allocation2 + $0x918] sm:$0xff] }
  0x7d   :  { %1494 = vmatpush1.bf16.msra.mxu1 %v1493_v12  ;;  %1304 = vmatprep.subr.bf16.mxu0 %v1303_v13  ;;  %v279_v12 = vld [vmem:[#allocation2 + $0x7c0] sm:$0xff]  ;;  %v1535_v14 = vpack.c.bf16 %v326_v6, %v322_v5 }
  0x7e   :  { %1496 = vmatprep.subr.bf16.mxu1 %v1495_v17  ;;  %v283_v13 = vld [vmem:[#allocation2 + $0x7e0] sm:$0xff]  ;;  %v288_v17 = vld [vmem:[#allocation2 + $0x808] sm:$0xff] }
  0x7f   :  { %v1325_v21 = vpack.c.bf16 %v283_v13, %v279_v12  ;;  %v323_v12 = vld [vmem:[#allocation2 + $0x920] sm:$0xff]  ;;  %v321_v13 = vld [vmem:[#allocation2 + $0x910] sm:$0xff] }
  0x80   :  { %1306 = vmatpush1.bf16.msra.mxu0 %v1305_v24  ;;  %v1327_v24 = vpack.c.bf16 %v292_v18, %v288_v17  ;;  %v332_v17 = vld [vmem:[#allocation2 + $0x968] sm:$0xff]  ;;  %v330_v18 = vld [vmem:[#allocation2 + $0x958] sm:$0xff] }
  0x81   :  { %1498 = vmatpush1.bf16.msra.mxu1 %v1497_v26  ;;  %1308 = vmatprep.subr.bf16.mxu0 %v1307_v27  ;;  %v287_v26 = vld [vmem:[#allocation2 + $0x800] sm:$0xff] }
  0x82   :  { %1500 = vmatprep.subr.bf16.mxu1 %v1499_v31  ;;  %v291_v27 = vld [vmem:[#allocation2 + $0x820] sm:$0xff]  ;;  %v296_v31 = vld [vmem:[#allocation2 + $0x848] sm:$0xff] }
  0x83   :  { %v1329_v35 = vpack.c.bf16 %v291_v27, %v287_v26  ;;  %v331_v26 = vld [vmem:[#allocation2 + $0x960] sm:$0xff]  ;;  %v329_v27 = vld [vmem:[#allocation2 + $0x950] sm:$0xff] }
  0x84   :  { %1310 = vmatpush1.bf16.msra.mxu0 %v1309_v37  ;;  %v1521_v37 = vpack.c.bf16 %v293_v30, %v289_v28  ;;  %v1539_v28 = vpack.c.bf16 %v334_v19, %v330_v18  ;;  %v336_v30 = vld [vmem:[#allocation2 + $0x988] sm:$0xff] }
  0x85   :  { %1502 = vmatpush1.bf16.msra.mxu1 %v1501_v11  ;;  %1312 = vmatprep.subr.bf16.mxu0 %v1311_v38  ;;  %v1331_v11 = vpack.c.bf16 %v300_v32, %v296_v31  ;;  %v295_v38 = vld [vmem:[#allocation2 + $0x840] sm:$0xff]  ;;  %v340_v31 = vld [vmem:[#allocation2 + $0x9a8] sm:$0xff]  ;;  %v338_v32 = vld [vmem:[#allocation2 + $0x998] sm:$0xff] }
  0x86   :  { %1504 = vmatprep.subr.bf16.mxu1 %v1503_v42  ;;  %v301_v42 = vld [vmem:[#allocation2 + $0x870] sm:$0xff] }
  0x88   :  { %1314 = vmatpush1.bf16.msra.mxu0 %v1313_v48  ;;  %v1333_v48 = vpack.c.bf16 %v299_v39, %v295_v38  ;;  %v339_v38 = vld [vmem:[#allocation2 + $0x9a0] sm:$0xff]  ;;  %v337_v39 = vld [vmem:[#allocation2 + $0x990] sm:$0xff] }
  0x89   :  { %1506 = vmatpush1.bf16.msra.mxu1 %v1505_v49  ;;  %1316 = vmatprep.subr.bf16.mxu0 %v1315_v50  ;;  %v1525_v49 = vpack.c.bf16 %v301_v42, %v297_v40  ;;  %v1335_v50 = vpack.c.bf16 %v308_v44, %v304_v43  ;;  %v1543_v40 = vpack.c.bf16 %v342_v33, %v338_v32  ;;  %v344_v42 = vld [vmem:[#allocation2 + $0x9c8] sm:$0xff]  ;;  %v346_v44 = vld [vmem:[#allocation2 + $0x9d8] sm:$0xff] }
  0x8a   :  { %1508 = vmatprep.subr.bf16.mxu1 %v1507_v53  ;;  %v1527_v53 = vpack.c.bf16 %v310_v47, %v306_v46  ;;  %v348_v43 = vld [vmem:[#allocation2 + $0x9e8] sm:$0xff] }
  0x8c   :  { %1318 = vmatpush1.bf16.msra.mxu0 %v1317_v59  ;;  %v1337_v59 = vpack.c.bf16 %v307_v52, %v303_v51  ;;  %v345_v51 = vld [vmem:[#allocation2 + $0x9d0] sm:$0xff] }
  0x8d   :  { %1510 = vmatpush1.bf16.msra.mxu1 %v1509_v60  ;;  %1320 = vmatprep.subr.bf16.mxu0 %v1319_v62  ;;  %v1339_v60 = vpack.c.bf16 %v316_v56, %v312_v55  ;;  %v311_v62 = vld [vmem:[#allocation2 + $0x8c0] sm:$0xff]  ;;  %v354_v55 = vld [vmem:[#allocation2 + $0xa18] sm:$0xff] }
  0x8e   :  { %1512 = vmatprep.subr.bf16.mxu1 %v1511_v2  ;;  %v317_v2 = vld [vmem:[#allocation2 + $0x8f0] sm:$0xff]  ;;  %v1341_v7 = vpack.c.bf16 %v315_v63, %v311_v62  ;;  %v358_v56 = vld [vmem:[#allocation2 + $0xa38] sm:$0xff] }
  0x8f   :  { %v353_v62 = vld [vmem:[#allocation2 + $0xa10] sm:$0xff]  ;;  %v1551_v63 = vpack.c.bf16 %v358_v56, %v354_v55 }
  0x90   :  { %1322 = vmatpush1.bf16.msra.mxu0 %v1321_v8  ;;  %v1533_v8 = vpack.c.bf16 %v317_v2, %v313_v0  ;;  %v357_v0 = vld [vmem:[#allocation2 + $0xa30] sm:$0xff]  ;;  %v364_v2 = vld [vmem:[#allocation2 + $0xa68] sm:$0xff] }
  0x91   :  { %1514 = vmatpush1.bf16.msra.mxu1 %v1513_v9  ;;  %1324 = vmatprep.subr.bf16.mxu0 %v1323_v10  ;;  %v1343_v9 = vpack.c.bf16 %v324_v4, %v320_v3  ;;  %v319_v10 = vld [vmem:[#allocation2 + $0x900] sm:$0xff]  ;;  %v362_v3 = vld [vmem:[#allocation2 + $0xa58] sm:$0xff]  ;;  %v1553_v6 = vpack.c.bf16 %v357_v0, %v353_v62  ;;  %v397_v62 = vld [vmem:[#allocation2 + $0xb70] sm:$0xff] }
  0x92   :  { %1516 = vmatprep.subr.bf16.mxu1 %v1515_v15  ;;  %v325_v15 = vld [vmem:[#allocation2 + $0x930] sm:$0xff]  ;;  %v1345_v20 = vpack.c.bf16 %v323_v12, %v319_v10  ;;  %v366_v4 = vld [vmem:[#allocation2 + $0xa78] sm:$0xff]  ;;  %v404_v0 = vld [vmem:[#allocation2 + $0xba8] sm:$0xff] }
  0x93   :  { %v361_v10 = vld [vmem:[#allocation2 + $0xa50] sm:$0xff]  ;;  %v1555_v12 = vpack.c.bf16 %v366_v4, %v362_v3 }
  0x94   :  { %1326 = vmatpush1.bf16.msra.mxu0 %v1325_v21  ;;  %v1537_v21 = vpack.c.bf16 %v325_v15, %v321_v13  ;;  %v365_v13 = vld [vmem:[#allocation2 + $0xa70] sm:$0xff]  ;;  %v372_v15 = vld [vmem:[#allocation2 + $0xaa8] sm:$0xff] }
  0x95   :  { %1518 = vmatpush1.bf16.msra.mxu1 %v1517_v23  ;;  %1328 = vmatprep.subr.bf16.mxu0 %v1327_v24  ;;  %v1347_v23 = vpack.c.bf16 %v332_v17, %v328_v16  ;;  %v327_v24 = vld [vmem:[#allocation2 + $0x940] sm:$0xff]  ;;  %v370_v16 = vld [vmem:[#allocation2 + $0xa98] sm:$0xff]  ;;  %v1557_v19 = vpack.c.bf16 %v365_v13, %v361_v10  ;;  %v405_v10 = vld [vmem:[#allocation2 + $0xbb0] sm:$0xff] }
  0x96   :  { %1520 = vmatprep.subr.bf16.mxu1 %v1519_v29  ;;  %v333_v29 = vld [vmem:[#allocation2 + $0x970] sm:$0xff]  ;;  %v1349_v34 = vpack.c.bf16 %v331_v26, %v327_v24  ;;  %v374_v17 = vld [vmem:[#allocation2 + $0xab8] sm:$0xff]  ;;  %v412_v13 = vld [vmem:[#allocation2 + $0xbe8] sm:$0xff] }
  0x97   :  { %607 = vmatmul.mubr.f32.vlgmr.msra.gmra.mrb[0].mxu0 %v1769_v22  ;;  %v369_v24 = vld [vmem:[#allocation2 + $0xa90] sm:$0xff]  ;;  %v1559_v26 = vpack.c.bf16 %v374_v17, %v370_v16 }
  0x98   :  { %1330 = vmatpush1.bf16.msra.mxu0 %v1329_v35  ;;  %820 = vmatmul.mubr.f32.vlgmr.msra.gmra.mrb[0].mxu1 %v1769_v22  ;;  %v1529_v22 = vpack.c.bf16 %v309_v54, %v305_v25  ;;  %v1541_v35 = vpack.c.bf16 %v333_v29, %v329_v27  ;;  %v349_v25 = vld [vmem:[#allocation2 + $0x9f0] sm:$0xff]  ;;  %v356_v54 = vld [vmem:[#allocation2 + $0xa28] sm:$0xff] }
  0x99   :  { %1522 = vmatpush1.bf16.msra.mxu1 %v1521_v37  ;;  %1332 = vmatprep.subr.bf16.mxu0 %v1331_v11  ;;  %v1351_v37 = vpack.c.bf16 %v340_v31, %v336_v30  ;;  %v335_v11 = vld [vmem:[#allocation2 + $0x980] sm:$0xff]  ;;  %v1549_v58 = vpack.c.bf16 %v349_v25, %v345_v51  ;;  %v373_v27 = vld [vmem:[#allocation2 + $0xab0] sm:$0xff]  ;;  %v380_v29 = vld [vmem:[#allocation2 + $0xae8] sm:$0xff] }
  0x9a   :  { %1524 = vmatprep.subr.bf16.mxu1 %v1523_v41  ;;  %677 = vmatprep.mubr.f32.mxu0 %v464_v45  ;;  %v341_v41 = vld [vmem:[#allocation2 + $0x9b0] sm:$0xff]  ;;  %v1353_v46 = vpack.c.bf16 %v339_v38, %v335_v11  ;;  %v378_v30 = vld [vmem:[#allocation2 + $0xad8] sm:$0xff]  ;;  %v1561_v33 = vpack.c.bf16 %v373_v27, %v369_v24  ;;  %v396_v25 = vld [vmem:[#allocation2 + $0xb68] sm:$0xff] }
  0x9b   :  { %890 = vmatprep.mubr.f32.mxu1 %v464_v45  ;;  %v350_v45 = vld [vmem:[#allocation2 + $0x9f8] sm:$0xff]  ;;  %v1545_v47 = vpack.c.bf16 %v341_v41, %v337_v39  ;;  %v377_v11 = vld [vmem:[#allocation2 + $0xad0] sm:$0xff]  ;;  %v388_v41 = vld [vmem:[#allocation2 + $0xb28] sm:$0xff] }
  0x9c   :  { %1334 = vmatpush1.bf16.msra.mxu0 %v1333_v48  ;;  %v1355_v48 = vpack.c.bf16 %v348_v43, %v344_v42  ;;  %v1547_v52 = vpack.c.bf16 %v350_v45, %v346_v44  ;;  %v382_v31 = vld [vmem:[#allocation2 + $0xaf8] sm:$0xff]  ;;  %v381_v39 = vld [vmem:[#allocation2 + $0xaf0] sm:$0xff]  ;;  %v918_v27 = vld [vmem:[%s1999_s2 + $0x88] sm:$0xff] }
  0x9d   :  { %1526 = vmatpush1.bf16.msra.mxu1 %v1525_v49  ;;  %1336 = vmatprep.subr.bf16.mxu0 %v1335_v50  ;;  %v343_v49 = vld [vmem:[#allocation2 + $0x9c0] sm:$0xff]  ;;  %v1563_v38 = vpack.c.bf16 %v382_v31, %v378_v30  ;;  %v386_v42 = vld [vmem:[#allocation2 + $0xb18] sm:$0xff]  ;;  %v1565_v45 = vpack.c.bf16 %v381_v39, %v377_v11  ;;  %v389_v51 = vld [vmem:[#allocation2 + $0xb30] sm:$0xff] }
  0x9e   :  { %1528 = vmatprep.subr.bf16.mxu1 %v1527_v53  ;;  %v347_v50 = vld [vmem:[#allocation2 + $0x9e0] sm:$0xff]  ;;  %v352_v53 = vld [vmem:[#allocation2 + $0xa08] sm:$0xff]  ;;  %v390_v43 = vld [vmem:[#allocation2 + $0xb38] sm:$0xff] }
  0x9f   :  { %v1357_v57 = vpack.c.bf16 %v347_v50, %v343_v49  ;;  %v385_v49 = vld [vmem:[#allocation2 + $0xb10] sm:$0xff]  ;;  %v1567_v50 = vpack.c.bf16 %v390_v43, %v386_v42  ;;  %v934_v11 = vld [vmem:[%s1999_s2 + $0x108] sm:$0xff]  ;;  %v920_v39 = vld [vmem:[%s1999_s2 + $0x98] sm:$0xff] }
  0xa0   :  { %1338 = vmatpush1.bf16.msra.mxu0 %v1337_v59  ;;  %v1359_v59 = vpack.c.bf16 %v356_v54, %v352_v53  ;;  %v394_v53 = vld [vmem:[#allocation2 + $0xb58] sm:$0xff]  ;;  %v1569_v56 = vpack.c.bf16 %v389_v51, %v385_v49  ;;  %v413_v24 = vld [vmem:[#allocation2 + $0xbf0] sm:$0xff]  ;;  %v922_v51 = vld [vmem:[%s1999_s2 + $0xa8] sm:$0xff] }
  0xa1   :  { %1530 = vmatpush1.bf16.msra.mxu1 %v1529_v22  ;;  %1340 = vmatprep.subr.bf16.mxu0 %v1339_v60  ;;  %v351_v22 = vld [vmem:[#allocation2 + $0xa00] sm:$0xff]  ;;  %v398_v54 = vld [vmem:[#allocation2 + $0xb78] sm:$0xff] }
  0xa2   :  { %1532 = vmatprep.subr.bf16.mxu1 %v1531_v1  ;;  %v355_v60 = vld [vmem:[#allocation2 + $0xa20] sm:$0xff]  ;;  %v360_v1 = vld [vmem:[#allocation2 + $0xa48] sm:$0xff]  ;;  %v936_v49 = vld [vmem:[%s1999_s2 + $0x118] sm:$0xff] }
  0xa3   :  { %v1361_v5 = vpack.c.bf16 %v355_v60, %v351_v22  ;;  %v393_v22 = vld [vmem:[#allocation2 + $0xb50] sm:$0xff]  ;;  %v1571_v60 = vpack.c.bf16 %v398_v54, %v394_v53 }
  0xa4   :  { %1342 = vmatpush1.bf16.msra.mxu0 %v1341_v7  ;;  %v1363_v7 = vpack.c.bf16 %v364_v2, %v360_v1  ;;  %v402_v1 = vld [vmem:[#allocation2 + $0xb98] sm:$0xff]  ;;  %v1573_v4 = vpack.c.bf16 %v397_v62, %v393_v22  ;;  %v923_v22 = vld [vmem:[%s1999_s2 + $0xb0] sm:$0xff] }
  0xa5   :  { %1534 = vmatpush1.bf16.msra.mxu1 %v1533_v8  ;;  %1344 = vmatprep.subr.bf16.mxu0 %v1343_v9  ;;  %v359_v8 = vld [vmem:[#allocation2 + $0xa40] sm:$0xff]  ;;  %v406_v2 = vld [vmem:[#allocation2 + $0xbb8] sm:$0xff]  ;;  %v955_v62 = vld [vmem:[%s1999_s2 + $0x1b0] sm:$0xff] }
  0xa6   :  { %1536 = vmatprep.subr.bf16.mxu1 %v1535_v14  ;;  %v363_v9 = vld [vmem:[#allocation2 + $0xa60] sm:$0xff]  ;;  %v368_v14 = vld [vmem:[#allocation2 + $0xa88] sm:$0xff] }
  0xa7   :  { %v1365_v18 = vpack.c.bf16 %v363_v9, %v359_v8  ;;  %v401_v8 = vld [vmem:[#allocation2 + $0xb90] sm:$0xff]  ;;  %v1575_v9 = vpack.c.bf16 %v406_v2, %v402_v1 }
  0xa8   :  { %1346 = vmatpush1.bf16.msra.mxu0 %v1345_v20  ;;  %v1367_v20 = vpack.c.bf16 %v372_v15, %v368_v14  ;;  %v410_v14 = vld [vmem:[#allocation2 + $0xbd8] sm:$0xff]  ;;  %v1577_v17 = vpack.c.bf16 %v405_v10, %v401_v8  ;;  %v925_v8 = vld [vmem:[%s1999_s2 + $0xc0] sm:$0xff] }
  0xa9   :  { %1538 = vmatpush1.bf16.msra.mxu1 %v1537_v21  ;;  %1348 = vmatprep.subr.bf16.mxu0 %v1347_v23  ;;  %v367_v21 = vld [vmem:[#allocation2 + $0xa80] sm:$0xff]  ;;  %v414_v15 = vld [vmem:[#allocation2 + $0xbf8] sm:$0xff] }
  0xaa   :  { %1540 = vmatprep.subr.bf16.mxu1 %v1539_v28  ;;  %v371_v23 = vld [vmem:[#allocation2 + $0xaa0] sm:$0xff]  ;;  %v376_v28 = vld [vmem:[#allocation2 + $0xac8] sm:$0xff] }
  0xab   :  { %v1369_v32 = vpack.c.bf16 %v371_v23, %v367_v21  ;;  %v409_v21 = vld [vmem:[#allocation2 + $0xbd0] sm:$0xff]  ;;  %v1579_v23 = vpack.c.bf16 %v414_v15, %v410_v14  ;;  %v957_v10 = vld [vmem:[%s1999_s2 + $0x1c0] sm:$0xff] }
  0xac   :  { %1350 = vmatpush1.bf16.msra.mxu0 %v1349_v34  ;;  %v1371_v34 = vpack.c.bf16 %v380_v29, %v376_v28  ;;  %v949_v28 = vld [vmem:[%s1999_s2 + $0x180] sm:$0xff]  ;;  %v950_v29 = vld [vmem:[%s1999_s2 + $0x188] sm:$0xff]  ;;  %v1581_v31 = vpack.c.bf16 %v413_v24, %v409_v21  ;;  %v927_v21 = vld [vmem:[%s1999_s2 + $0xd0] sm:$0xff] }
  0xad   :  { %1542 = vmatpush1.bf16.msra.mxu1 %v1541_v35  ;;  %1352 = vmatprep.subr.bf16.mxu0 %v1351_v37  ;;  %v375_v35 = vld [vmem:[#allocation2 + $0xac0] sm:$0xff]  ;;  %v959_v24 = vld [vmem:[%s1999_s2 + $0x1d0] sm:$0xff] }
  0xae   :  { %1544 = vmatprep.subr.bf16.mxu1 %v1543_v40  ;;  %v379_v37 = vld [vmem:[#allocation2 + $0xae0] sm:$0xff]  ;;  %v384_v40 = vld [vmem:[#allocation2 + $0xb08] sm:$0xff] }
  0xaf   :  { %v1373_v44 = vpack.c.bf16 %v379_v37, %v375_v35  ;;  %v933_v35 = vld [vmem:[%s1999_s2 + $0x100] sm:$0xff]  ;;  %v1615_v37 = vpack.c.bf16 %v950_v29, %v949_v28 }
  0xb0   :  { %1354 = vmatpush1.bf16.msra.mxu0 %v1353_v46  ;;  %v1375_v46 = vpack.c.bf16 %v388_v41, %v384_v40  ;;  %v951_v40 = vld [vmem:[%s1999_s2 + $0x190] sm:$0xff]  ;;  %v952_v41 = vld [vmem:[%s1999_s2 + $0x198] sm:$0xff]  ;;  %v1617_v43 = vpack.c.bf16 %v934_v11, %v933_v35  ;;  %v929_v35 = vld [vmem:[%s1999_s2 + $0xe0] sm:$0xff] }
  0xb1   :  { %1546 = vmatpush1.bf16.msra.mxu1 %v1545_v47  ;;  %1356 = vmatprep.subr.bf16.mxu0 %v1355_v48  ;;  %v383_v47 = vld [vmem:[#allocation2 + $0xb00] sm:$0xff] }
  0xb2   :  { %1548 = vmatprep.subr.bf16.mxu1 %v1547_v52  ;;  %v387_v48 = vld [vmem:[#allocation2 + $0xb20] sm:$0xff]  ;;  %v392_v52 = vld [vmem:[#allocation2 + $0xb48] sm:$0xff] }
  0xb3   :  { %v1377_v55 = vpack.c.bf16 %v387_v48, %v383_v47  ;;  %v935_v47 = vld [vmem:[%s1999_s2 + $0x110] sm:$0xff]  ;;  %v1619_v48 = vpack.c.bf16 %v952_v41, %v951_v40  ;;  %v961_v11 = vld [vmem:[%s1999_s2 + $0x1e0] sm:$0xff] }
  0xb4   :  { %1358 = vmatpush1.bf16.msra.mxu0 %v1357_v57  ;;  %v1379_v57 = vpack.c.bf16 %v396_v25, %v392_v52  ;;  %v953_v52 = vld [vmem:[%s1999_s2 + $0x1a0] sm:$0xff]  ;;  %v954_v25 = vld [vmem:[%s1999_s2 + $0x1a8] sm:$0xff]  ;;  %v1621_v54 = vpack.c.bf16 %v936_v49, %v935_v47  ;;  %v931_v49 = vld [vmem:[%s1999_s2 + $0xf0] sm:$0xff] }
  0xb5   :  { %1550 = vmatpush1.bf16.msra.mxu1 %v1549_v58  ;;  %1360 = vmatprep.subr.bf16.mxu0 %v1359_v59  ;;  %v391_v58 = vld [vmem:[#allocation2 + $0xb40] sm:$0xff]  ;;  %v946_v47 = vld [vmem:[%s1999_s2 + $0x168] sm:$0xff] }
  0xb6   :  { %1552 = vmatprep.subr.bf16.mxu1 %v1551_v63  ;;  %v395_v59 = vld [vmem:[#allocation2 + $0xb60] sm:$0xff]  ;;  %v400_v63 = vld [vmem:[#allocation2 + $0xb88] sm:$0xff] }
  0xb7   :  { %v1381_v3 = vpack.c.bf16 %v395_v59, %v391_v58  ;;  %v937_v58 = vld [vmem:[%s1999_s2 + $0x120] sm:$0xff]  ;;  %v938_v59 = vld [vmem:[%s1999_s2 + $0x128] sm:$0xff] }
  0xb8   :  { %1362 = vmatpush1.bf16.msra.mxu0 %v1361_v5  ;;  %v1383_v5 = vpack.c.bf16 %v404_v0, %v400_v63  ;;  %v956_v63 = vld [vmem:[%s1999_s2 + $0x1b8] sm:$0xff]  ;;  %v1625_v1 = vpack.c.bf16 %v938_v59, %v937_v58  ;;  %v420_v59 = vsub.s32 0, %v1750_v61 }
  0xb9   :  { %1554 = vmatpush1.bf16.msra.mxu1 %v1553_v6  ;;  %1364 = vmatprep.subr.bf16.mxu0 %v1363_v7  ;;  %v399_v6 = vld [vmem:[#allocation2 + $0xb80] sm:$0xff]  ;;  %v948_v58 = vld [vmem:[%s1999_s2 + $0x178] sm:$0xff] }
  0xba   :  { %1556 = vmatprep.subr.bf16.mxu1 %v1555_v12  ;;  %v403_v7 = vld [vmem:[#allocation2 + $0xba0] sm:$0xff]  ;;  %v408_v12 = vld [vmem:[#allocation2 + $0xbc8] sm:$0xff] }
  0xbb   :  { %v1385_v16 = vpack.c.bf16 %v403_v7, %v399_v6  ;;  %v1627_v6 = vpack.c.bf16 %v956_v63, %v955_v62  ;;  %v940_v7 = vld [vmem:[%s1999_s2 + $0x138] sm:$0xff]  ;;  %v424_v62 = vsub.s32 1, %v1750_v61  ;;  %v432_v63 = vsub.s32 3, %v1750_v61 }
  0xbc   :  { %1366 = vmatpush1.bf16.msra.mxu0 %v1365_v18  ;;  %v1387_v18 = vpack.c.bf16 %v412_v13, %v408_v12  ;;  %v958_v12 = vld [vmem:[%s1999_s2 + $0x1c8] sm:$0xff] }
  0xbd   :  { %1558 = vmatpush1.bf16.msra.mxu1 %v1557_v19  ;;  %1368 = vmatprep.subr.bf16.mxu0 %v1367_v20  ;;  %v407_v19 = vld [vmem:[#allocation2 + $0xbc0] sm:$0xff] }
  0xbe   :  { %1560 = vmatprep.subr.bf16.mxu1 %v1559_v26  ;;  %v411_v20 = vld [vmem:[#allocation2 + $0xbe0] sm:$0xff] }
  0xbf   :  { %v917_v26 = vld [vmem:[%s1999_s2 + $0x80] sm:$0xff]  ;;  %v1389_v30 = vpack.c.bf16 %v411_v20, %v407_v19  ;;  %v1631_v19 = vpack.c.bf16 %v958_v12, %v957_v10  ;;  %v942_v20 = vld [vmem:[%s1999_s2 + $0x148] sm:$0xff] }
  0xc0   :  { %1370 = vmatpush1.bf16.msra.mxu0 %v1369_v32  ;;  %v1583_v32 = vpack.c.bf16 %v918_v27, %v917_v26  ;;  %v960_v26 = vld [vmem:[%s1999_s2 + $0x1d8] sm:$0xff] }
  0xc1   :  { %1562 = vmatpush1.bf16.msra.mxu1 %v1561_v33  ;;  %1372 = vmatprep.subr.bf16.mxu0 %v1371_v34  ;;  %v901_v33 = vld [vmem:[%s1999_s2] sm:$0xff]  ;;  %v902_v34 = vld [vmem:[%s1999_s2 + $0x8] sm:$0xff] }
  0xc2   :  { %1564 = vmatprep.subr.bf16.mxu1 %v1563_v38  ;;  %v919_v38 = vld [vmem:[%s1999_s2 + $0x90] sm:$0xff]  ;;  %v1585_v42 = vpack.c.bf16 %v902_v34, %v901_v33  ;;  %v1635_v33 = vpack.c.bf16 %v960_v26, %v959_v24  ;;  %v944_v34 = vld [vmem:[%s1999_s2 + $0x158] sm:$0xff] }
  0xc4   :  { %1374 = vmatpush1.bf16.msra.mxu0 %v1373_v44  ;;  %v1587_v44 = vpack.c.bf16 %v920_v39, %v919_v38  ;;  %v962_v38 = vld [vmem:[%s1999_s2 + $0x1e8] sm:$0xff] }
  0xc5   :  { %1566 = vmatpush1.bf16.msra.mxu1 %v1565_v45  ;;  %1376 = vmatprep.subr.bf16.mxu0 %v1375_v46  ;;  %v903_v45 = vld [vmem:[%s1999_s2 + $0x10] sm:$0xff]  ;;  %v904_v46 = vld [vmem:[%s1999_s2 + $0x18] sm:$0xff] }
  0xc6   :  { %1568 = vmatprep.subr.bf16.mxu1 %v1567_v50  ;;  %v921_v50 = vld [vmem:[%s1999_s2 + $0xa0] sm:$0xff]  ;;  %v1589_v53 = vpack.c.bf16 %v904_v46, %v903_v45 }
  0xc7   :  { %v945_v45 = vld [vmem:[%s1999_s2 + $0x160] sm:$0xff] }
  0xc8   :  { %1378 = vmatpush1.bf16.msra.mxu0 %v1377_v55  ;;  %v1591_v55 = vpack.c.bf16 %v922_v51, %v921_v50  ;;  %v932_v50 = vld [vmem:[%s1999_s2 + $0xf8] sm:$0xff]  ;;  %v963_v51 = vld [vmem:[%s1999_s2 + $0x1f0] sm:$0xff] }
  0xc9   :  { %1570 = vmatpush1.bf16.msra.mxu1 %v1569_v56  ;;  %1380 = vmatprep.subr.bf16.mxu0 %v1379_v57  ;;  %v905_v56 = vld [vmem:[%s1999_s2 + $0x20] sm:$0xff]  ;;  %v906_v57 = vld [vmem:[%s1999_s2 + $0x28] sm:$0xff] }
  0xca   :  { %1572 = vmatprep.subr.bf16.mxu1 %v1571_v60  ;;  %v924_v60 = vld [vmem:[%s1999_s2 + $0xb8] sm:$0xff]  ;;  %v1593_v0 = vpack.c.bf16 %v906_v57, %v905_v56  ;;  %v947_v57 = vld [vmem:[%s1999_s2 + $0x170] sm:$0xff] }
  0xcb   :  { %v1595_v2 = vpack.c.bf16 %v924_v60, %v923_v22  ;;  %v416_v22 = vld [vmem:[#allocation2 + $0xc00] ss:$8 sm:$0xf]  ;;  %v428_v60 = vsub.s32 2, %v1750_v61 }
  0xcc   :  { %1382 = vmatpush1.bf16.msra.mxu0 %v1381_v3  ;;  %v907_v3 = vld [vmem:[%s1999_s2 + $0x30] sm:$0xff] }
  0xcd   :  { %1574 = vmatpush1.bf16.msra.mxu1 %v1573_v4  ;;  %1384 = vmatprep.subr.bf16.mxu0 %v1383_v5  ;;  %v908_v4 = vld [vmem:[%s1999_s2 + $0x38] sm:$0xff]  ;;  %v939_v5 = vld [vmem:[%s1999_s2 + $0x130] sm:$0xff] }
  0xce   :  { %1576 = vmatprep.subr.bf16.mxu1 %v1575_v9  ;;  %v926_v9 = vld [vmem:[%s1999_s2 + $0xc8] sm:$0xff]  ;;  %v1597_v13 = vpack.c.bf16 %v908_v4, %v907_v3  ;;  %v1629_v14 = vpack.c.bf16 %v940_v7, %v939_v5  ;;  %v433_v3 = vrot.slane %v416_v22, %v432_v63 }
  0xcf   :  { %v1599_v15 = vpack.c.bf16 %v926_v9, %v925_v8 }
  0xd0   :  { %1386 = vmatpush1.bf16.msra.mxu0 %v1385_v16  ;;  %v909_v16 = vld [vmem:[%s1999_s2 + $0x40] sm:$0xff] }
  0xd1   :  { %1578 = vmatpush1.bf16.msra.mxu1 %v1577_v17  ;;  %1388 = vmatprep.subr.bf16.mxu0 %v1387_v18  ;;  %v910_v17 = vld [vmem:[%s1999_s2 + $0x48] sm:$0xff]  ;;  %v941_v18 = vld [vmem:[%s1999_s2 + $0x140] sm:$0xff] }
  0xd2   :  { %1580 = vmatprep.subr.bf16.mxu1 %v1579_v23  ;;  %v928_v23 = vld [vmem:[%s1999_s2 + $0xd8] sm:$0xff]  ;;  %v1601_v27 = vpack.c.bf16 %v910_v17, %v909_v16  ;;  %v1633_v28 = vpack.c.bf16 %v942_v20, %v941_v18  ;;  %v1128_v18 = vld [vmem:[%s1999_s2 + $0x200] ss:$0 sm:$0xff] }
  0xd3   :  { %v1603_v29 = vpack.c.bf16 %v928_v23, %v927_v21 }
  0xd4   :  { %1390 = vmatpush1.bf16.msra.mxu0 %v1389_v30  ;;  %v911_v30 = vld [vmem:[%s1999_s2 + $0x50] sm:$0xff] }
  0xd5   :  { %1582 = vmatpush1.bf16.msra.mxu1 %v1581_v31  ;;  %1584 = vmatprep.subr.bf16.mxu0 %v1583_v32  ;;  %v912_v31 = vld [vmem:[%s1999_s2 + $0x58] sm:$0xff]  ;;  %v943_v32 = vld [vmem:[%s1999_s2 + $0x150] sm:$0xff] }
  0xd6   :  { %1616 = vmatprep.subr.bf16.mxu1 %v1615_v37  ;;  %v930_v37 = vld [vmem:[%s1999_s2 + $0xe8] sm:$0xff]  ;;  %v1605_v39 = vpack.c.bf16 %v912_v31, %v911_v30  ;;  %v1637_v40 = vpack.c.bf16 %v944_v34, %v943_v32 }
  0xd7   :  { %678 = vmatmul.mubr.f32.vlgmr.msra.gmra.mrb[0].mxu0 %v1778_v36  ;;  %v1607_v41 = vpack.c.bf16 %v930_v37, %v929_v35 }
  0xd8   :  { %891 = vmatmul.mubr.f32.vlgmr.msra.gmra.mrb[0].mxu1 %v1778_v36  ;;  %1586 = vmatpush3.bf16.msra.mxu0 %v1585_v42  ;;  %v1623_v36 = vpack.c.bf16 %v954_v25, %v953_v52  ;;  %v1639_v42 = vpack.c.bf16 %v962_v38, %v961_v11  ;;  %v1611_v52 = vpack.c.bf16 %v932_v50, %v931_v49  ;;  %v964_v25 = vld [vmem:[%s1999_s2 + $0x1f8] sm:$0xff] }
  0xd9   :  { %1618 = vmatpush3.bf16.msra.mxu1 %v1617_v43  ;;  %1588 = vmatprep.subr.bf16.mxu0 %v1587_v44  ;;  %v913_v43 = vld [vmem:[%s1999_s2 + $0x60] sm:$0xff]  ;;  %v914_v44 = vld [vmem:[%s1999_s2 + $0x68] sm:$0xff] }
  0xda   :  { %1620 = vmatprep.subr.bf16.mxu1 %v1619_v48  ;;  %v1609_v46 = vpack.c.bf16 %v914_v44, %v913_v43  ;;  %v1641_v48 = vpack.c.bf16 %v946_v47, %v945_v45 }
  0xdc   :  { %1590 = vmatpush3.bf16.msra.mxu0 %v1589_v53  ;;  %v915_v53 = vld [vmem:[%s1999_s2 + $0x70] sm:$0xff] }
  0xdd   :  { %1622 = vmatpush3.bf16.msra.mxu1 %v1621_v54  ;;  %1592 = vmatprep.subr.bf16.mxu0 %v1591_v55  ;;  %v916_v54 = vld [vmem:[%s1999_s2 + $0x78] sm:$0xff]  ;;  %v1643_v55 = vpack.c.bf16 %v964_v25, %v963_v51 }
  0xde   :  { %1624 = vmatprep.subr.bf16.mxu1 %v1623_v36  ;;  %v1613_v56 = vpack.c.bf16 %v916_v54, %v915_v53  ;;  %v1645_v36 = vpack.c.bf16 %v948_v58, %v947_v57 }
  0xe0   :  { %1594 = vmatpush3.bf16.msra.mxu0 %v1593_v0  ;;  %v421_v0 = vrot.slane %v416_v22, %v420_v59 }
  0xe1   :  { %1626 = vmatpush3.bf16.msra.mxu1 %v1625_v1  ;;  %1596 = vmatprep.subr.bf16.mxu0 %v1595_v2  ;;  %v429_v1 = vrot.slane %v416_v22, %v428_v60  ;;  %v425_v2 = vrot.slane %v416_v22, %v424_v62 }
  0xe2   :  { %1628 = vmatprep.subr.bf16.mxu1 %v1627_v6 }
  0xe4   :  { %1598 = vmatpush3.bf16.msra.mxu0 %v1597_v13 }
  0xe5   :  { %1630 = vmatpush3.bf16.msra.mxu1 %v1629_v14  ;;  %1600 = vmatprep.subr.bf16.mxu0 %v1599_v15 }
  0xe6   :  { %1632 = vmatprep.subr.bf16.mxu1 %v1631_v19 }
  0xe8   :  { %1602 = vmatpush3.bf16.msra.mxu0 %v1601_v27 }
  0xe9   :  { %1634 = vmatpush3.bf16.msra.mxu1 %v1633_v28  ;;  %1604 = vmatprep.subr.bf16.mxu0 %v1603_v29 }
  0xea   :  { %1636 = vmatprep.subr.bf16.mxu1 %v1635_v33 }
  0xec   :  { %1606 = vmatpush3.bf16.msra.mxu0 %v1605_v39 }
  0xed   :  { %1638 = vmatpush3.bf16.msra.mxu1 %v1637_v40  ;;  %1608 = vmatprep.subr.bf16.mxu0 %v1607_v41 }
  0xee   :  { %1640 = vmatprep.subr.bf16.mxu1 %v1639_v42 }
  0xf0   :  { %1610 = vmatpush3.bf16.msra.mxu0 %v1609_v46 }
  0xf1   :  { %1642 = vmatpush3.bf16.msra.mxu1 %v1641_v48  ;;  %1612 = vmatprep.subr.bf16.mxu0 %v1611_v52 }
  0xf2   :  { %1644 = vmatprep.subr.bf16.mxu1 %v1643_v55 }
  0xf4   :  { %1614 = vmatpush3.bf16.msra.mxu0 %v1613_v56 }
  0xf5   :  { %1646 = vmatpush3.bf16.msra.mxu1 %v1645_v36 }
 0x1aa   :  { %v679_v4 = vpop.f32.mrb[0].mxu0 }
 0x1ab   :  { %v1647_v5 = vadd.f32 %v679_v4, %v421_v0  ;;  %v892_v6 = vpop.f32.mrb[0].mxu1  ;;  %v681_v7 = vpop.f32.mrb[1].mxu0 }
 0x1ac   :  { %v1649_v8 = vadd.f32 %v892_v6, %v429_v1  ;;  %v1648_v9 = vadd.f32 %v681_v7, %v425_v2  ;;  %v894_v10 = vpop.f32.mrb[1].mxu1 }
 0x1ad   :  { %v1650_v12 = vadd.f32 %v894_v10, %v433_v3  ;;  %v897_v14 = vmax.f32 %v1647_v5, 0.0 }
 0x1ae   :  { %v898_v13 = vmax.f32 %v1648_v9, 0.0  ;;  %v899_v16 = vmax.f32 %v1649_v8, 0.0 }
 0x1af   :  { %v900_v15 = vmax.f32 %v1650_v12, 0.0 }
 0x1b0   :  { %1034 = vmatprep.mubr.f32.mxu0 %v898_v13 }
 0x1b1   :  { %1104 = vmatprep.mubr.f32.mxu1 %v900_v15  ;;  %1035 = vmatmul.mubr.f32.vlgmr.msra.gmra.mrb[2].mxu0 %v897_v14 }
 0x1b2   :  { %1105 = vmatmul.mubr.f32.vlgmr.msra.gmra.mrb[2].mxu1 %v899_v16 }
 0x284   :  { %v1161_v61 = vpop.f32.mrb[2].mxu0 }
 0x285   :  { %v1196_v17 = vpop.f32.mrb[2].mxu1  ;;  %v1162_v19 = vpop.f32.mrb[3].mxu0 }
 0x286   :  { %v1163_v20 = vadd.f32 %v1162_v19, %v1161_v61  ;;  %v1197_v21 = vpop.f32.mrb[3].mxu1 }
 0x287   :  { %v1198_v23 = vadd.f32 %v1197_v21, %v1196_v17 }
 0x288   :  { %v1037_v24 = vadd.f32 %v1163_v20, %v1128_v18 }
 0x28a   :  { %v1107_v26 = vadd.f32 %v1198_v23, %v1037_v24 }
 0x28c   :  { %1111 = vst.msk [vmem:[#allocation5] sm:$0x3] %vm1110_vm0, %v1107_v26 }
 0x28d   :  { %1698 = shalt.err (!%p1695_p12)
}
 0x28e   :  { %s1699_s19 = scalar_lea.hbm %s2000_s3, 32 }
 0x28f   :  { %p1700_p13 = scmp.ne.s32.totalorder %s2000_s3, %s1699_s19  ;;  %p1703_p0 = scmp.lt.u32.totalorder %s1699_s19, %s2000_s3 }
 0x291   :  { %p1705_p1 = pnand %p1703_p0, %p1700_p13 }
 0x293   :  { %1708 = shalt.err (!%p1705_p1)
}
 0x294   :  { %1121 = dma.vmem_to_hbm [thread:$0]  %s1119_s16, 32, %s2000_s3, [#allocation4]  }
 0x295   :  { %1711 = dma.done.wait [#allocation4], 32  }
 0x296   :  { %1712 = vsyncadd [#allocation4], 4294967264 }
 0x297   :  { %1125 = vsyncpa [#allocation3], 1 }
 0x298   :  { %1126 = vsyncpa [#allocation4], 1 }

</bundles_post_ra>
